<compile_context>
chip_gen: v7x
topology: tpu7x:2x2x1
jax: 0.10.0
libtpu: 0.0.40
codegen_flags: <defaults>
</compile_context>

<pallas_src>
import functools

import jax
import jax.numpy as jnp
from jax.experimental import pallas as pl
from jax.experimental.pallas import tpu as pltpu

NEG_SLOPE = 0.01                      # nn.LeakyReLU() default
_VMEM_LIMIT = 32 * 1024 * 1024        # safe on v5e/v6e/v7x (<= physical on all)


def _round_up(n, m):
    return (n + m - 1) // m * m


def _pick_tm(m, cap):
    """Row-tile: cap for big M (pipelined), else M rounded up to sublane (8)."""
    return cap if m >= cap else max(8, _round_up(m, 8))


# ----------------------------- Pallas kernels --------------------------------
def _mm_bias_act_kernel(x_ref, w_ref, b_ref, o_ref, *, leaky):
    # x: (tm, K), w: (K, Np), b: (1, Np) -> o: (tm, Np); f32 accumulation.
    y = jnp.dot(x_ref[...], w_ref[...], preferred_element_type=jnp.float32)
    y = y + b_ref[...]
    if leaky:
        y = jnp.where(y >= 0, y, NEG_SLOPE * y)
    o_ref[...] = y.astype(o_ref.dtype)


def _fused_fc_kernel(x_ref, w1_ref, b1_ref, w2_ref, b2_ref, o_ref):
    # fc1 + LeakyReLU + fc2 fused; (B,512) intermediate never leaves VMEM.
    h = jnp.dot(x_ref[...], w1_ref[...], preferred_element_type=jnp.float32)
    h = h + b1_ref[...]
    h = jnp.where(h >= 0, h, NEG_SLOPE * h)
    y = jnp.dot(h.astype(w2_ref.dtype), w2_ref[...],
                preferred_element_type=jnp.float32)
    y = y + b2_ref[...]
    o_ref[...] = y.astype(o_ref.dtype)


# ----------------------------- Kernel wrappers --------------------------------
def pallas_linear(x, w, b, *, leaky, tm_cap=256, use_bf16=False):
    """y = leaky_relu?(x @ w + b). w/b are pre-padded so N % 128 == 0.

    Tiled over M with a "parallel" grid axis; weights/bias stay resident
    (constant block index) across the grid. Returns (M, Np) f32.
    """
    M, K = x.shape
    Kw, Np = w.shape
    assert K == Kw and Np % 128 == 0
    tm = _pick_tm(M, tm_cap)
    Mp = _round_up(M, tm)
    if Mp != M:
        x = jnp.pad(x, ((0, Mp - M), (0, 0)))
    if use_bf16:
        x = x.astype(jnp.bfloat16)
        w = w.astype(jnp.bfloat16)
    b = b.reshape(1, Np).astype(jnp.float32)

    bytes_accessed = (Mp * K * x.dtype.itemsize + K * Np * w.dtype.itemsize
                      + Np * 4 + Mp * Np * 4)
    out = pl.pallas_call(
        functools.partial(_mm_bias_act_kernel, leaky=leaky),
        out_shape=jax.ShapeDtypeStruct((Mp, Np), jnp.float32),
        grid=(Mp // tm,),
        in_specs=[pl.BlockSpec((tm, K), lambda i: (i, 0)),
                  pl.BlockSpec((K, Np), lambda i: (0, 0)),
                  pl.BlockSpec((1, Np), lambda i: (0, 0))],
        out_specs=pl.BlockSpec((tm, Np), lambda i: (i, 0)),
        compiler_params=pltpu.CompilerParams(
            dimension_semantics=("parallel",),
            vmem_limit_bytes=_VMEM_LIMIT),
        cost_estimate=pl.CostEstimate(
            flops=2 * Mp * K * Np, transcendentals=0,
            bytes_accessed=int(bytes_accessed)),
    )(x, w, b)
    return out[:M]


def pallas_fused_fc(x, w1, b1, w2, b2, *, tm_cap=128, use_bf16=False):
    """leaky_relu(x @ w1 + b1) @ w2 + b2 in one kernel. w2/b2 padded to 128."""
    M, K = x.shape
    K1, H = w1.shape
    H2, Np = w2.shape
    assert K == K1 and H == H2 and H % 128 == 0 and Np % 128 == 0
    tm = _pick_tm(M, tm_cap)
    Mp = _round_up(M, tm)
    if Mp != M:
        x = jnp.pad(x, ((0, Mp - M), (0, 0)))
    if use_bf16:
        x = x.astype(jnp.bfloat16)
        w1 = w1.astype(jnp.bfloat16)
        w2 = w2.astype(jnp.bfloat16)
    b1 = b1.reshape(1, H).astype(jnp.float32)
    b2 = b2.reshape(1, Np).astype(jnp.float32)

    bytes_accessed = (Mp * K * x.dtype.itemsize + K * H * w1.dtype.itemsize
                      + H * Np * w2.dtype.itemsize + (H + Np) * 4 + Mp * Np * 4)
    out = pl.pallas_call(
        _fused_fc_kernel,
        out_shape=jax.ShapeDtypeStruct((Mp, Np), jnp.float32),
        grid=(Mp // tm,),
        in_specs=[pl.BlockSpec((tm, K), lambda i: (i, 0)),
                  pl.BlockSpec((K, H), lambda i: (0, 0)),
                  pl.BlockSpec((1, H), lambda i: (0, 0)),
                  pl.BlockSpec((H, Np), lambda i: (0, 0)),
                  pl.BlockSpec((1, Np), lambda i: (0, 0))],
        out_specs=pl.BlockSpec((tm, Np), lambda i: (i, 0)),
        compiler_params=pltpu.CompilerParams(
            dimension_semantics=("parallel",),
            vmem_limit_bytes=_VMEM_LIMIT),
        cost_estimate=pl.CostEstimate(
            flops=2 * Mp * (K * H + H * Np), transcendentals=0,
            bytes_accessed=int(bytes_accessed)),
    )(x, w1, b1, w2, b2)
    return out[:M]


# ------------------------------ Conv (NHWC) -----------------------------------
def conv2d_leaky_nhwc(x, wm, b, *, kh, kw, stride, use_bf16=False):
    """PyTorch-semantics Conv2d (no padding) + LeakyReLU, NHWC in / NHWC out.

    x:  (B, H, W, Cin)
    wm: (KH*KW*Cin, Cout_pad) with rows ordered (kh, kw, cin), Cout padded to 128
    b:  (Cout_pad,)
    returns (B, OH, OW, Cout_pad); padded channels are exactly zero.
    """
    B, H, W, Cin = x.shape
    OH = (H - kh) // stride + 1
    OW = (W - kw) // stride + 1
    # Transpose-free NHWC im2col (strided slices + stack + contiguous reshape).
    # TODO(synk): fold the (kh, kw) loop into the kernel as a reduction grid
    # axis to avoid the KH*KW HBM expansion; the strided overlapping windows
    # cannot be expressed by BlockSpec and would need manual strided-window
    # DMA, so this patch extraction stays as plain-JAX glue.
    windows = []
    for dh in range(kh):
        for dw in range(kw):
            windows.append(x[:, dh:dh + stride * (OH - 1) + 1:stride,
                              dw:dw + stride * (OW - 1) + 1:stride, :])
    p = jnp.stack(windows, axis=3)                    # (B, OH, OW, KH*KW, Cin)
    p = p.reshape(B * OH * OW, kh * kw * Cin)
    y = pallas_linear(p, wm, b, leaky=True, tm_cap=256, use_bf16=use_bf16)
    return y.reshape(B, OH, OW, wm.shape[1])


# ------------------------------ Parameters ------------------------------------
def _uniform(key, shape, fan_in):
    bound = 1.0 / jnp.sqrt(jnp.float32(fan_in))
    return jax.random.uniform(key, shape, jnp.float32, -bound, bound)


def _conv_out_hw(h, w):
    oh, ow = (h - 8) // 4 + 1, (w - 8) // 4 + 1
    oh, ow = (oh - 4) // 2 + 1, (ow - 4) // 2 + 1
    oh, ow = (oh - 3) // 1 + 1, (ow - 3) // 1 + 1
    return oh, ow


def init_cnn_dqn_params(key, inputs_shape, num_actions):
    """Raw PyTorch-layout parameters (nn.Conv2d / nn.Linear default init)."""
    cin, H, W = inputs_shape
    ks = jax.random.split(key, 10)
    p = {}
    p["w1"] = _uniform(ks[0], (32, cin, 8, 8), cin * 8 * 8)
    p["b1"] = _uniform(ks[1], (32,), cin * 8 * 8)
    p["w2"] = _uniform(ks[2], (64, 32, 4, 4), 32 * 4 * 4)
    p["b2"] = _uniform(ks[3], (64,), 32 * 4 * 4)
    p["w3"] = _uniform(ks[4], (64, 64, 3, 3), 64 * 3 * 3)
    p["b3"] = _uniform(ks[5], (64,), 64 * 3 * 3)
    oh, ow = _conv_out_hw(H, W)
    feat = 64 * oh * ow
    p["wf1"] = _uniform(ks[6], (feat, 512), feat)     # (in, out) layout
    p["bf1"] = _uniform(ks[7], (512,), feat)
    p["wf2"] = _uniform(ks[8], (512, num_actions), 512)
    p["bf2"] = _uniform(ks[9], (num_actions,), 512)
    return p


def prepare_params(raw, inputs_shape, num_actions):
    """One-time weight re-layout: conv weights -> (kh,kw,cin)-major matrices
    padded to 128 output lanes; fc1 rows permuted NCHW-flatten -> NHWC-flatten;
    fc2 output padded to 128 lanes."""
    _, H, W = inputs_shape
    oh3, ow3 = _conv_out_hw(H, W)

    def conv_mat(w, b):
        cout, cin, kh, kw = w.shape
        coutp = _round_up(max(cout, 128), 128)
        wm = jnp.transpose(w, (2, 3, 1, 0)).reshape(kh * kw * cin, cout)
        return (jnp.pad(wm, ((0, 0), (0, coutp - cout))),
                jnp.pad(b, (0, coutp - cout)))

    wm1, b1 = conv_mat(raw["w1"], raw["b1"])
    wm2, b2 = conv_mat(raw["w2"], raw["b2"])
    wm3, b3 = conv_mat(raw["w3"], raw["b3"])

    feat = 64 * oh3 * ow3
    # rows of wf1 are indexed (c, oh, ow) in PyTorch flatten order; re-index to
    # the NHWC flatten order (oh, ow, c) used between kernels.
    wf1 = raw["wf1"].reshape(64, oh3, ow3, 512)
    wf1 = jnp.transpose(wf1, (1, 2, 0, 3)).reshape(feat, 512)

    nap = _round_up(max(num_actions, 128), 128)
    wf2 = jnp.pad(raw["wf2"], ((0, 0), (0, nap - num_actions)))
    bf2 = jnp.pad(raw["bf2"], (0, nap - num_actions))

    return dict(wm1=wm1, b1=b1, wm2=wm2, b2=b2, wm3=wm3, b3=b3,
                wf1=wf1, bf1=raw["bf1"], wf2=wf2, bf2=bf2)


# ------------------------------ Forward ----------------------------------------
def cnn_dqn_forward(params, x_nchw, *, num_actions, use_bf16=False):
    """x_nchw: (B, Cin, H, W) f32 -> (B, num_actions) f32."""
    p = params
    x = jnp.transpose(x_nchw, (0, 2, 3, 1))   # single NCHW->NHWC at the входе
    y = conv2d_leaky_nhwc(x, p["wm1"], p["b1"], kh=8, kw=8, stride=4,
                          use_bf16=use_bf16)
    y = conv2d_leaky_nhwc(y[..., :32], p["wm2"], p["b2"], kh=4, kw=4, stride=2,
                          use_bf16=use_bf16)
    y = conv2d_leaky_nhwc(y[..., :64], p["wm3"], p["b3"], kh=3, kw=3, stride=1,
                          use_bf16=use_bf16)
    B = y.shape[0]
    feat = y[..., :64].reshape(B, -1)         # NHWC flatten (wf1 pre-permuted)
    q = pallas_fused_fc(feat, p["wf1"], p["bf1"], p["wf2"], p["bf2"],
                        use_bf16=use_bf16)
    return q[:, :num_actions]


if __name__ == "__main__":
    # Small but conv-valid shapes: (Cin=4, H=W=36) -> conv stack 8 -> 3 -> 1.
    inputs_shape = (4, 36, 36)
    num_actions = 6
    batch = 2

    key = jax.random.PRNGKey(0)
    pkey, xkey = jax.random.split(key)
    raw_params = init_cnn_dqn_params(pkey, inputs_shape, num_actions)
    params = prepare_params(raw_params, inputs_shape, num_actions)
    x = jax.random.normal(xkey, (batch,) + inputs_shape, jnp.float32)

    fwd = jax.jit(functools.partial(cnn_dqn_forward, num_actions=num_actions))
    out = jax.block_until_ready(fwd(params, x))
    assert out.shape == (batch, num_actions), out.shape
    assert bool(jnp.all(jnp.isfinite(out)))
    print("KERNEL_OK")
</pallas_src>

<mosaic_0001>
module attributes {stable_mosaic.version = 11 : i64} {
  func.func @_mm_bias_act_kernel(%arg0: i32, %arg1: memref<128x256xf32, #tpu.memory_space<vmem>>, %arg2: memref<256x128xf32, #tpu.memory_space<vmem>>, %arg3: memref<1x128xf32, #tpu.memory_space<vmem>>, %arg4: memref<128x128xf32, #tpu.memory_space<vmem>>) attributes {dimension_semantics = [#tpu.dimension_semantics<parallel>], iteration_bounds = array<i64: 1>, scalar_prefetch = 0 : i64, scratch_operands = 0 : i64, tpu.core_type = #tpu.core_type<tc>, window_params = [{transform_indices = @transform_0, window_bounds = array<i64: 128, 256>}, {pipeline_mode = #tpu.pipeline_mode<synchronous>, transform_indices = @transform_1, window_bounds = array<i64: 256, 128>}, {pipeline_mode = #tpu.pipeline_mode<synchronous>, transform_indices = @transform_2, window_bounds = array<i64: 1, 128>}, {transform_indices = @transform_3, window_bounds = array<i64: 128, 128>}]} {
    %c0 = arith.constant 0 : index
    %c0_0 = arith.constant 0 : index
    %0 = vector.load %arg1[%c0, %c0_0] : memref<128x256xf32, #tpu.memory_space<vmem>>, vector<128x256xf32>
    %c0_1 = arith.constant 0 : index
    %c0_2 = arith.constant 0 : index
    %1 = vector.load %arg2[%c0_1, %c0_2] : memref<256x128xf32, #tpu.memory_space<vmem>>, vector<256x128xf32>
    %cst = arith.constant dense<0.000000e+00> : vector<128x128xf32>
    %2 = tpu.matmul %0, %1, %cst {dimension_numbers = #tpu.dot_dimension_numbers<[1], [0], [0], [1], [0, 0, 1, 1], [], []>} : vector<128x256xf32>, vector<256x128xf32>, vector<128x128xf32> -> vector<128x128xf32>
    %c0_3 = arith.constant 0 : index
    %c0_4 = arith.constant 0 : index
    %3 = vector.load %arg3[%c0_3, %c0_4] : memref<1x128xf32, #tpu.memory_space<vmem>>, vector<1x128xf32>
    %4 = vector.broadcast %3 : vector<1x128xf32> to vector<128x128xf32>
    %5 = arith.addf %2, %4 : vector<128x128xf32>
    %cst_5 = arith.constant 0.000000e+00 : f32
    %6 = vector.broadcast %cst_5 : f32 to vector<128x128xf32>
    %7 = arith.cmpf oge, %5, %6 : vector<128x128xf32>
    %cst_6 = arith.constant 0.00999999977 : f32
    %8 = vector.broadcast %cst_6 : f32 to vector<128x128xf32>
    %9 = arith.mulf %8, %5 : vector<128x128xf32>
    %10 = arith.select %7, %5, %9 : vector<128x128xi1>, vector<128x128xf32>
    %c0_7 = arith.constant 0 : index
    %c0_8 = arith.constant 0 : index
    %11 = vector.load %arg4[%c0_7, %c0_8] : memref<128x128xf32, #tpu.memory_space<vmem>>, vector<128x128xf32>
    tpu.vector_store %arg4[%c0_7, %c0_8], %10 {strides = array<i32>} : memref<128x128xf32, #tpu.memory_space<vmem>>, vector<128x128xf32>,
    return
  }
  func.func @transform_0(%arg0: i32) -> (i32, i32) {
    %c0_i32 = arith.constant 0 : i32
    %c0_i32_0 = arith.constant 0 : i32
    return %arg0, %c0_i32 : i32, i32
  }
  func.func @transform_1(%arg0: i32) -> (i32, i32) {
    %c0_i32 = arith.constant 0 : i32
    %c0_i32_0 = arith.constant 0 : i32
    %c0_i32_1 = arith.constant 0 : i32
    return %c0_i32, %c0_i32_0 : i32, i32
  }
  func.func @transform_2(%arg0: i32) -> (i32, i32) {
    %c0_i32 = arith.constant 0 : i32
    %c0_i32_0 = arith.constant 0 : i32
    %c0_i32_1 = arith.constant 0 : i32
    return %c0_i32, %c0_i32_0 : i32, i32
  }
  func.func @transform_3(%arg0: i32) -> (i32, i32) {
    %c0_i32 = arith.constant 0 : i32
    %c0_i32_0 = arith.constant 0 : i32
    return %arg0, %c0_i32 : i32, i32
  }
}

module attributes {stable_mosaic.version = 11 : i64} {
  func.func @_mm_bias_act_kernel(%arg0: i32, %arg1: memref<24x512xf32, #tpu.memory_space<vmem>>, %arg2: memref<512x128xf32, #tpu.memory_space<vmem>>, %arg3: memref<1x128xf32, #tpu.memory_space<vmem>>, %arg4: memref<24x128xf32, #tpu.memory_space<vmem>>) attributes {dimension_semantics = [#tpu.dimension_semantics<parallel>], iteration_bounds = array<i64: 1>, scalar_prefetch = 0 : i64, scratch_operands = 0 : i64, tpu.core_type = #tpu.core_type<tc>, window_params = [{transform_indices = @transform_0, window_bounds = array<i64: 24, 512>}, {pipeline_mode = #tpu.pipeline_mode<synchronous>, transform_indices = @transform_1, window_bounds = array<i64: 512, 128>}, {pipeline_mode = #tpu.pipeline_mode<synchronous>, transform_indices = @transform_2, window_bounds = array<i64: 1, 128>}, {transform_indices = @transform_3, window_bounds = array<i64: 24, 128>}]} {
    %c0 = arith.constant 0 : index
    %c0_0 = arith.constant 0 : index
    %0 = vector.load %arg1[%c0, %c0_0] : memref<24x512xf32, #tpu.memory_space<vmem>>, vector<24x512xf32>
    %c0_1 = arith.constant 0 : index
    %c0_2 = arith.constant 0 : index
    %1 = vector.load %arg2[%c0_1, %c0_2] : memref<512x128xf32, #tpu.memory_space<vmem>>, vector<512x128xf32>
    %cst = arith.constant dense<0.000000e+00> : vector<24x128xf32>
    %2 = tpu.matmul %0, %1, %cst {dimension_numbers = #tpu.dot_dimension_numbers<[1], [0], [0], [1], [0, 0, 1, 1], [], []>} : vector<24x512xf32>, vector<512x128xf32>, vector<24x128xf32> -> vector<24x128xf32>
    %c0_3 = arith.constant 0 : index
    %c0_4 = arith.constant 0 : index
    %3 = vector.load %arg3[%c0_3, %c0_4] : memref<1x128xf32, #tpu.memory_space<vmem>>, vector<1x128xf32>
    %4 = vector.broadcast %3 : vector<1x128xf32> to vector<24x128xf32>
    %5 = arith.addf %2, %4 : vector<24x128xf32>
    %cst_5 = arith.constant 0.000000e+00 : f32
    %6 = vector.broadcast %cst_5 : f32 to vector<24x128xf32>
    %7 = arith.cmpf oge, %5, %6 : vector<24x128xf32>
    %cst_6 = arith.constant 0.00999999977 : f32
    %8 = vector.broadcast %cst_6 : f32 to vector<24x128xf32>
    %9 = arith.mulf %8, %5 : vector<24x128xf32>
    %10 = arith.select %7, %5, %9 : vector<24x128xi1>, vector<24x128xf32>
    %c0_7 = arith.constant 0 : index
    %c0_8 = arith.constant 0 : index
    %11 = vector.load %arg4[%c0_7, %c0_8] : memref<24x128xf32, #tpu.memory_space<vmem>>, vector<24x128xf32>
    tpu.vector_store %arg4[%c0_7, %c0_8], %10 {strides = array<i32>} : memref<24x128xf32, #tpu.memory_space<vmem>>, vector<24x128xf32>,
    return
  }
  func.func @transform_0(%arg0: i32) -> (i32, i32) {
    %c0_i32 = arith.constant 0 : i32
    %c0_i32_0 = arith.constant 0 : i32
    return %arg0, %c0_i32 : i32, i32
  }
  func.func @transform_1(%arg0: i32) -> (i32, i32) {
    %c0_i32 = arith.constant 0 : i32
    %c0_i32_0 = arith.constant 0 : i32
    %c0_i32_1 = arith.constant 0 : i32
    return %c0_i32, %c0_i32_0 : i32, i32
  }
  func.func @transform_2(%arg0: i32) -> (i32, i32) {
    %c0_i32 = arith.constant 0 : i32
    %c0_i32_0 = arith.constant 0 : i32
    %c0_i32_1 = arith.constant 0 : i32
    return %c0_i32, %c0_i32_0 : i32, i32
  }
  func.func @transform_3(%arg0: i32) -> (i32, i32) {
    %c0_i32 = arith.constant 0 : i32
    %c0_i32_0 = arith.constant 0 : i32
    return %arg0, %c0_i32 : i32, i32
  }
}

module attributes {stable_mosaic.version = 11 : i64} {
  func.func @_mm_bias_act_kernel(%arg0: i32, %arg1: memref<8x576xf32, #tpu.memory_space<vmem>>, %arg2: memref<576x128xf32, #tpu.memory_space<vmem>>, %arg3: memref<1x128xf32, #tpu.memory_space<vmem>>, %arg4: memref<8x128xf32, #tpu.memory_space<vmem>>) attributes {dimension_semantics = [#tpu.dimension_semantics<parallel>], iteration_bounds = array<i64: 1>, scalar_prefetch = 0 : i64, scratch_operands = 0 : i64, tpu.core_type = #tpu.core_type<tc>, window_params = [{transform_indices = @transform_0, window_bounds = array<i64: 8, 576>}, {pipeline_mode = #tpu.pipeline_mode<synchronous>, transform_indices = @transform_1, window_bounds = array<i64: 576, 128>}, {pipeline_mode = #tpu.pipeline_mode<synchronous>, transform_indices = @transform_2, window_bounds = array<i64: 1, 128>}, {transform_indices = @transform_3, window_bounds = array<i64: 8, 128>}]} {
    %c0 = arith.constant 0 : index
    %c0_0 = arith.constant 0 : index
    %0 = vector.load %arg1[%c0, %c0_0] : memref<8x576xf32, #tpu.memory_space<vmem>>, vector<8x576xf32>
    %c0_1 = arith.constant 0 : index
    %c0_2 = arith.constant 0 : index
    %1 = vector.load %arg2[%c0_1, %c0_2] : memref<576x128xf32, #tpu.memory_space<vmem>>, vector<576x128xf32>
    %cst = arith.constant dense<0.000000e+00> : vector<8x128xf32>
    %2 = tpu.matmul %0, %1, %cst {dimension_numbers = #tpu.dot_dimension_numbers<[1], [0], [0], [1], [0, 0, 1, 1], [], []>} : vector<8x576xf32>, vector<576x128xf32>, vector<8x128xf32> -> vector<8x128xf32>
    %c0_3 = arith.constant 0 : index
    %c0_4 = arith.constant 0 : index
    %3 = vector.load %arg3[%c0_3, %c0_4] : memref<1x128xf32, #tpu.memory_space<vmem>>, vector<1x128xf32>
    %4 = vector.broadcast %3 : vector<1x128xf32> to vector<8x128xf32>
    %5 = arith.addf %2, %4 : vector<8x128xf32>
    %cst_5 = arith.constant 0.000000e+00 : f32
    %6 = vector.broadcast %cst_5 : f32 to vector<8x128xf32>
    %7 = arith.cmpf oge, %5, %6 : vector<8x128xf32>
    %cst_6 = arith.constant 0.00999999977 : f32
    %8 = vector.broadcast %cst_6 : f32 to vector<8x128xf32>
    %9 = arith.mulf %8, %5 : vector<8x128xf32>
    %10 = arith.select %7, %5, %9 : vector<8x128xi1>, vector<8x128xf32>
    %c0_7 = arith.constant 0 : index
    %c0_8 = arith.constant 0 : index
    %11 = vector.load %arg4[%c0_7, %c0_8] : memref<8x128xf32, #tpu.memory_space<vmem>>, vector<8x128xf32>
    tpu.vector_store %arg4[%c0_7, %c0_8], %10 {strides = array<i32>} : memref<8x128xf32, #tpu.memory_space<vmem>>, vector<8x128xf32>,
    return
  }
  func.func @transform_0(%arg0: i32) -> (i32, i32) {
    %c0_i32 = arith.constant 0 : i32
    %c0_i32_0 = arith.constant 0 : i32
    return %arg0, %c0_i32 : i32, i32
  }
  func.func @transform_1(%arg0: i32) -> (i32, i32) {
    %c0_i32 = arith.constant 0 : i32
    %c0_i32_0 = arith.constant 0 : i32
    %c0_i32_1 = arith.constant 0 : i32
    return %c0_i32, %c0_i32_0 : i32, i32
  }
  func.func @transform_2(%arg0: i32) -> (i32, i32) {
    %c0_i32 = arith.constant 0 : i32
    %c0_i32_0 = arith.constant 0 : i32
    %c0_i32_1 = arith.constant 0 : i32
    return %c0_i32, %c0_i32_0 : i32, i32
  }
  func.func @transform_3(%arg0: i32) -> (i32, i32) {
    %c0_i32 = arith.constant 0 : i32
    %c0_i32_0 = arith.constant 0 : i32
    return %arg0, %c0_i32 : i32, i32
  }
}

module attributes {stable_mosaic.version = 11 : i64} {
  func.func @_fused_fc_kernel(%arg0: i32, %arg1: memref<8x64xf32, #tpu.memory_space<vmem>>, %arg2: memref<64x512xf32, #tpu.memory_space<vmem>>, %arg3: memref<1x512xf32, #tpu.memory_space<vmem>>, %arg4: memref<512x128xf32, #tpu.memory_space<vmem>>, %arg5: memref<1x128xf32, #tpu.memory_space<vmem>>, %arg6: memref<8x128xf32, #tpu.memory_space<vmem>>) attributes {dimension_semantics = [#tpu.dimension_semantics<parallel>], iteration_bounds = array<i64: 1>, scalar_prefetch = 0 : i64, scratch_operands = 0 : i64, tpu.core_type = #tpu.core_type<tc>, window_params = [{transform_indices = @transform_0, window_bounds = array<i64: 8, 64>}, {pipeline_mode = #tpu.pipeline_mode<synchronous>, transform_indices = @transform_1, window_bounds = array<i64: 64, 512>}, {pipeline_mode = #tpu.pipeline_mode<synchronous>, transform_indices = @transform_2, window_bounds = array<i64: 1, 512>}, {pipeline_mode = #tpu.pipeline_mode<synchronous>, transform_indices = @transform_3, window_bounds = array<i64: 512, 128>}, {pipeline_mode = #tpu.pipeline_mode<synchronous>, transform_indices = @transform_4, window_bounds = array<i64: 1, 128>}, {transform_indices = @transform_5, window_bounds = array<i64: 8, 128>}]} {
    %c0 = arith.constant 0 : index
    %c0_0 = arith.constant 0 : index
    %0 = vector.load %arg1[%c0, %c0_0] : memref<8x64xf32, #tpu.memory_space<vmem>>, vector<8x64xf32>
    %c0_1 = arith.constant 0 : index
    %c0_2 = arith.constant 0 : index
    %1 = vector.load %arg2[%c0_1, %c0_2] : memref<64x512xf32, #tpu.memory_space<vmem>>, vector<64x512xf32>
    %cst = arith.constant dense<0.000000e+00> : vector<8x512xf32>
    %2 = tpu.matmul %0, %1, %cst {dimension_numbers = #tpu.dot_dimension_numbers<[1], [0], [0], [1], [0, 0, 1, 1], [], []>} : vector<8x64xf32>, vector<64x512xf32>, vector<8x512xf32> -> vector<8x512xf32>
    %c0_3 = arith.constant 0 : index
    %c0_4 = arith.constant 0 : index
    %3 = vector.load %arg3[%c0_3, %c0_4] : memref<1x512xf32, #tpu.memory_space<vmem>>, vector<1x512xf32>
    %4 = vector.broadcast %3 : vector<1x512xf32> to vector<8x512xf32>
    %5 = arith.addf %2, %4 : vector<8x512xf32>
    %cst_5 = arith.constant 0.000000e+00 : f32
    %6 = vector.broadcast %cst_5 : f32 to vector<8x512xf32>
    %7 = arith.cmpf oge, %5, %6 : vector<8x512xf32>
    %cst_6 = arith.constant 0.00999999977 : f32
    %8 = vector.broadcast %cst_6 : f32 to vector<8x512xf32>
    %9 = arith.mulf %8, %5 : vector<8x512xf32>
    %10 = arith.select %7, %5, %9 : vector<8x512xi1>, vector<8x512xf32>
    %c0_7 = arith.constant 0 : index
    %c0_8 = arith.constant 0 : index
    %11 = vector.load %arg4[%c0_7, %c0_8] : memref<512x128xf32, #tpu.memory_space<vmem>>, vector<512x128xf32>
    %cst_9 = arith.constant dense<0.000000e+00> : vector<8x128xf32>
    %12 = tpu.matmul %10, %11, %cst_9 {dimension_numbers = #tpu.dot_dimension_numbers<[1], [0], [0], [1], [0, 0, 1, 1], [], []>} : vector<8x512xf32>, vector<512x128xf32>, vector<8x128xf32> -> vector<8x128xf32>
    %c0_10 = arith.constant 0 : index
    %c0_11 = arith.constant 0 : index
    %13 = vector.load %arg5[%c0_10, %c0_11] : memref<1x128xf32, #tpu.memory_space<vmem>>, vector<1x128xf32>
    %14 = vector.broadcast %13 : vector<1x128xf32> to vector<8x128xf32>
    %15 = arith.addf %12, %14 : vector<8x128xf32>
    %c0_12 = arith.constant 0 : index
    %c0_13 = arith.constant 0 : index
    %16 = vector.load %arg6[%c0_12, %c0_13] : memref<8x128xf32, #tpu.memory_space<vmem>>, vector<8x128xf32>
    tpu.vector_store %arg6[%c0_12, %c0_13], %15 {strides = array<i32>} : memref<8x128xf32, #tpu.memory_space<vmem>>, vector<8x128xf32>,
    return
  }
  func.func @transform_0(%arg0: i32) -> (i32, i32) {
    %c0_i32 = arith.constant 0 : i32
    %c0_i32_0 = arith.constant 0 : i32
    return %arg0, %c0_i32 : i32, i32
  }
  func.func @transform_1(%arg0: i32) -> (i32, i32) {
    %c0_i32 = arith.constant 0 : i32
    %c0_i32_0 = arith.constant 0 : i32
    %c0_i32_1 = arith.constant 0 : i32
    return %c0_i32, %c0_i32_0 : i32, i32
  }
  func.func @transform_2(%arg0: i32) -> (i32, i32) {
    %c0_i32 = arith.constant 0 : i32
    %c0_i32_0 = arith.constant 0 : i32
    %c0_i32_1 = arith.constant 0 : i32
    return %c0_i32, %c0_i32_0 : i32, i32
  }
  func.func @transform_3(%arg0: i32) -> (i32, i32) {
    %c0_i32 = arith.constant 0 : i32
    %c0_i32_0 = arith.constant 0 : i32
    %c0_i32_1 = arith.constant 0 : i32
    return %c0_i32, %c0_i32_0 : i32, i32
  }
  func.func @transform_4(%arg0: i32) -> (i32, i32) {
    %c0_i32 = arith.constant 0 : i32
    %c0_i32_0 = arith.constant 0 : i32
    %c0_i32_1 = arith.constant 0 : i32
    return %c0_i32, %c0_i32_0 : i32, i32
  }
  func.func @transform_5(%arg0: i32) -> (i32, i32) {
    %c0_i32 = arith.constant 0 : i32
    %c0_i32_0 = arith.constant 0 : i32
    return %arg0, %c0_i32 : i32, i32
  }
}

</mosaic_0001>

<bundles_post_ra>
// kernel: cnn_dqn_forward.4
= control target key start
LH: loop header
LB: loop body
LE: loop exit
PB: predicated region body
PF: predicated region fallthrough
CT: control target
= control target key end

     0   :  { %s708_s1 = inlined_call_operand.vmem [shape: f32[256,128], index: 1, kind: input, shape index: {}]   ;;  %s709_s0 = inlined_call_operand.vmem [shape: f32[128,256], index: 0, kind: input, shape index: {}]   ;;  %s710_s2 = inlined_call_operand.vmem [shape: f32[1,128], index: 2, kind: input, shape index: {}]   ;;  %s711_s3 = inlined_call_operand.vmem [shape: f32[128,128], index: 3, kind: output, shape index: {}]  }
   0x1   :  { %v62_v0 = vld [vmem:[%s708_s1 + $0x80] sm:$0xff]  ;;  %v63_v1 = vld [vmem:[%s708_s1 + $0x88] sm:$0xff]  ;;  %v64_v5 = vld [vmem:[%s708_s1 + $0x90] sm:$0xff] }
   0x2   :  { %v46_v2 = vld [vmem:[%s708_s1] sm:$0xff]  ;;  %v379_v3 = vpack.c.bf16 %v63_v1, %v62_v0  ;;  %v47_v4 = vld [vmem:[%s708_s1 + $0x8] sm:$0xff]  ;;  %v65_v6 = vld [vmem:[%s708_s1 + $0x98] sm:$0xff] }
   0x3   :  { %v381_v7 = vpack.c.bf16 %v47_v4, %v46_v2  ;;  %v383_v8 = vpack.c.bf16 %v65_v6, %v64_v5  ;;  %v48_v9 = vld [vmem:[%s708_s1 + $0x10] sm:$0xff]  ;;  %v49_v10 = vld [vmem:[%s708_s1 + $0x18] sm:$0xff]  ;;  %v66_v11 = vld [vmem:[%s708_s1 + $0xa0] sm:$0xff] }
   0x4   :  { %380 = vmatprep.subr.bf16.mxu0 %v379_v3  ;;  %411 = vmatprep.subr.bf16.mxu1 %v379_v3  ;;  %v67_v12 = vld [vmem:[%s708_s1 + $0xa8] sm:$0xff]  ;;  %v385_v13 = vpack.c.bf16 %v49_v10, %v48_v9  ;;  %v50_v15 = vld [vmem:[%s708_s1 + $0x20] sm:$0xff]  ;;  %v68_v17 = vld [vmem:[%s708_s1 + $0xb0] sm:$0xff] }
   0x5   :  { %382 = vmatpush3.bf16.msra.mxu0 %v381_v7  ;;  %419 = vmatpush3.bf16.msra.mxu1 %v381_v7  ;;  %v387_v14 = vpack.c.bf16 %v67_v12, %v66_v11  ;;  %v51_v16 = vld [vmem:[%s708_s1 + $0x28] sm:$0xff]  ;;  %v69_v18 = vld [vmem:[%s708_s1 + $0xb8] sm:$0xff]  ;;  %v52_v21 = vld [vmem:[%s708_s1 + $0x30] sm:$0xff] }
   0x6   :  { %384 = vmatprep.subr.bf16.mxu0 %v383_v8  ;;  %412 = vmatprep.subr.bf16.mxu1 %v383_v8  ;;  %v389_v19 = vpack.c.bf16 %v51_v16, %v50_v15  ;;  %v391_v20 = vpack.c.bf16 %v69_v18, %v68_v17  ;;  %v53_v22 = vld [vmem:[%s708_s1 + $0x38] sm:$0xff]  ;;  %v70_v23 = vld [vmem:[%s708_s1 + $0xc0] sm:$0xff]  ;;  %v71_v24 = vld [vmem:[%s708_s1 + $0xc8] sm:$0xff] }
   0x7   :  { %v15_v25 = vld [vmem:[%s709_s0 + $0x8] sm:$0xff]  ;;  %v393_v27 = vpack.c.bf16 %v53_v22, %v52_v21  ;;  %v395_v28 = vpack.c.bf16 %v71_v24, %v70_v23  ;;  %v54_v29 = vld [vmem:[%s708_s1 + $0x40] sm:$0xff]  ;;  %v72_v31 = vld [vmem:[%s708_s1 + $0xd0] sm:$0xff] }
   0x8   :  { %149 = vmatprep.mubr.f32.mxu0 %v15_v25  ;;  %v31_v26 = vld [vmem:[%s709_s0 + $0x88] sm:$0xff]  ;;  %v73_v32 = vld [vmem:[%s708_s1 + $0xd8] sm:$0xff]  ;;  %v56_v35 = vld [vmem:[%s708_s1 + $0x50] sm:$0xff] }
   0x9   :  { %386 = vmatpush3.bf16.msra.mxu0 %v385_v13  ;;  %420 = vmatpush3.bf16.msra.mxu1 %v385_v13  ;;  %v55_v30 = vld [vmem:[%s708_s1 + $0x48] sm:$0xff]  ;;  %v399_v34 = vpack.c.bf16 %v73_v32, %v72_v31  ;;  %v57_v36 = vld [vmem:[%s708_s1 + $0x58] sm:$0xff]  ;;  %v74_v37 = vld [vmem:[%s708_s1 + $0xe0] sm:$0xff] }
   0xa   :  { %388 = vmatprep.subr.bf16.mxu0 %v387_v14  ;;  %413 = vmatprep.subr.bf16.mxu1 %v387_v14  ;;  %v397_v33 = vpack.c.bf16 %v55_v30, %v54_v29  ;;  %v75_v38 = vld [vmem:[%s708_s1 + $0xe8] sm:$0xff]  ;;  %v401_v39 = vpack.c.bf16 %v57_v36, %v56_v35  ;;  %v58_v41 = vld [vmem:[%s708_s1 + $0x60] sm:$0xff]  ;;  %v76_v43 = vld [vmem:[%s708_s1 + $0xf0] sm:$0xff] }
   0xb   :  { %189 = vmatprep.mubr.f32.mxu1 %v31_v26  ;;  %v403_v40 = vpack.c.bf16 %v75_v38, %v74_v37  ;;  %v59_v42 = vld [vmem:[%s708_s1 + $0x68] sm:$0xff]  ;;  %v77_v44 = vld [vmem:[%s708_s1 + $0xf8] sm:$0xff]  ;;  %v60_v47 = vld [vmem:[%s708_s1 + $0x70] sm:$0xff] }
   0xc   :  { %v405_v45 = vpack.c.bf16 %v59_v42, %v58_v41  ;;  %v407_v46 = vpack.c.bf16 %v77_v44, %v76_v43  ;;  %v61_v48 = vld [vmem:[%s708_s1 + $0x78] sm:$0xff]  ;;  %v14_v50 = vld [vmem:[%s709_s0] sm:$0xff]  ;;  %v16_v54 = vld [vmem:[%s709_s0 + $0x10] sm:$0xff] }
   0xd   :  { %390 = vmatpush3.bf16.msra.mxu0 %v389_v19  ;;  %421 = vmatpush3.bf16.msra.mxu1 %v389_v19  ;;  %v409_v49 = vpack.c.bf16 %v61_v48, %v60_v47  ;;  %v30_v51 = vld [vmem:[%s709_s0 + $0x80] sm:$0xff]  ;;  %v17_v52 = vld [vmem:[%s709_s0 + $0x18] sm:$0xff]  ;;  %v32_v55 = vld [vmem:[%s709_s0 + $0x90] sm:$0xff] }
   0xe   :  { %392 = vmatprep.subr.bf16.mxu0 %v391_v20  ;;  %414 = vmatprep.subr.bf16.mxu1 %v391_v20  ;;  %v33_v53 = vld [vmem:[%s709_s0 + $0x98] sm:$0xff]  ;;  %v19_v56 = vld [vmem:[%s709_s0 + $0x28] sm:$0xff]  ;;  %v18_v58 = vld [vmem:[%s709_s0 + $0x20] sm:$0xff] }
   0xf   :  { %v35_v57 = vld [vmem:[%s709_s0 + $0xa8] sm:$0xff]  ;;  %v34_v59 = vld [vmem:[%s709_s0 + $0xa0] sm:$0xff]  ;;  %v21_v60 = vld [vmem:[%s709_s0 + $0x38] sm:$0xff] }
  0x10   :  { %v37_v61 = vld [vmem:[%s709_s0 + $0xb8] sm:$0xff]  ;;  %v20_v62 = vld [vmem:[%s709_s0 + $0x30] sm:$0xff]  ;;  %v23_v0 = vld [vmem:[%s709_s0 + $0x48] sm:$0xff] }
  0x11   :  { %394 = vmatpush3.bf16.msra.mxu0 %v393_v27  ;;  %422 = vmatpush3.bf16.msra.mxu1 %v393_v27  ;;  %v36_v63 = vld [vmem:[%s709_s0 + $0xb0] sm:$0xff]  ;;  %v39_v1 = vld [vmem:[%s709_s0 + $0xc8] sm:$0xff]  ;;  %v22_v2 = vld [vmem:[%s709_s0 + $0x40] sm:$0xff] }
  0x12   :  { %396 = vmatprep.subr.bf16.mxu0 %v395_v28  ;;  %415 = vmatprep.subr.bf16.mxu1 %v395_v28  ;;  %v38_v3 = vld [vmem:[%s709_s0 + $0xc0] sm:$0xff]  ;;  %v25_v4 = vld [vmem:[%s709_s0 + $0x58] sm:$0xff]  ;;  %v24_v6 = vld [vmem:[%s709_s0 + $0x50] sm:$0xff] }
  0x13   :  { %v41_v5 = vld [vmem:[%s709_s0 + $0xd8] sm:$0xff]  ;;  %v40_v7 = vld [vmem:[%s709_s0 + $0xd0] sm:$0xff]  ;;  %v27_v8 = vld [vmem:[%s709_s0 + $0x68] sm:$0xff] }
  0x14   :  { %v43_v9 = vld [vmem:[%s709_s0 + $0xe8] sm:$0xff]  ;;  %v26_v10 = vld [vmem:[%s709_s0 + $0x60] sm:$0xff]  ;;  %v29_v12 = vld [vmem:[%s709_s0 + $0x78] sm:$0xff] }
  0x15   :  { %398 = vmatpush3.bf16.msra.mxu0 %v397_v33  ;;  %423 = vmatpush3.bf16.msra.mxu1 %v397_v33  ;;  %v42_v11 = vld [vmem:[%s709_s0 + $0xe0] sm:$0xff]  ;;  %v45_v13 = vld [vmem:[%s709_s0 + $0xf8] sm:$0xff]  ;;  %v28_v14 = vld [vmem:[%s709_s0 + $0x70] sm:$0xff] }
  0x16   :  { %400 = vmatprep.subr.bf16.mxu0 %v399_v34  ;;  %416 = vmatprep.subr.bf16.mxu1 %v399_v34  ;;  %v44_v15 = vld [vmem:[%s709_s0 + $0xf0] sm:$0xff]  ;;  %v642_v18 = vld [vmem:[%s710_s2] ss:$0 sm:$0xff] }
  0x19   :  { %402 = vmatpush3.bf16.msra.mxu0 %v401_v39  ;;  %424 = vmatpush3.bf16.msra.mxu1 %v401_v39 }
  0x1a   :  { %404 = vmatprep.subr.bf16.mxu0 %v403_v40  ;;  %417 = vmatprep.subr.bf16.mxu1 %v403_v40 }
  0x1d   :  { %406 = vmatpush3.bf16.msra.mxu0 %v405_v45  ;;  %425 = vmatpush3.bf16.msra.mxu1 %v405_v45 }
  0x1e   :  { %408 = vmatprep.subr.bf16.mxu0 %v407_v46  ;;  %418 = vmatprep.subr.bf16.mxu1 %v407_v46 }
  0x21   :  { %410 = vmatpush3.bf16.msra.mxu0 %v409_v49  ;;  %426 = vmatpush3.bf16.msra.mxu1 %v409_v49 }
  0x24   :  { %150 = vmatmul.mubr.f32.vlgmr.msra.gmra.mrb[0].mxu0 %v14_v50  ;;  %190 = vmatmul.mubr.f32.vlgmr.msra.gmra.mrb[0].mxu1 %v30_v51 }
  0x25   :  { %154 = vmatprep.mubr.f32.mxu0 %v17_v52  ;;  %194 = vmatprep.mubr.f32.mxu1 %v33_v53 }
  0x28   :  { %155 = vmatmul.mubr.f32.gmra.mrb[2].mxu0 %v16_v54  ;;  %195 = vmatmul.mubr.f32.gmra.mrb[2].mxu1 %v32_v55 }
  0x29   :  { %159 = vmatprep.mubr.f32.mxu0 %v19_v56  ;;  %199 = vmatprep.mubr.f32.mxu1 %v35_v57 }
  0x2c   :  { %160 = vmatmul.mubr.f32.gmra.mrb[4].mxu0 %v18_v58  ;;  %200 = vmatmul.mubr.f32.gmra.mrb[4].mxu1 %v34_v59 }
  0x2d   :  { %164 = vmatprep.mubr.f32.mxu0 %v21_v60  ;;  %204 = vmatprep.mubr.f32.mxu1 %v37_v61 }
  0x30   :  { %165 = vmatmul.mubr.f32.gmra.mrb[6].mxu0 %v20_v62  ;;  %205 = vmatmul.mubr.f32.gmra.mrb[6].mxu1 %v36_v63 }
  0x31   :  { %169 = vmatprep.mubr.f32.mxu0 %v23_v0  ;;  %209 = vmatprep.mubr.f32.mxu1 %v39_v1 }
  0x34   :  { %170 = vmatmul.mubr.f32.gmra.mrb[8].mxu0 %v22_v2  ;;  %210 = vmatmul.mubr.f32.gmra.mrb[8].mxu1 %v38_v3 }
  0x35   :  { %174 = vmatprep.mubr.f32.mxu0 %v25_v4  ;;  %214 = vmatprep.mubr.f32.mxu1 %v41_v5 }
  0x38   :  { %175 = vmatmul.mubr.f32.gmra.mrb[10].mxu0 %v24_v6  ;;  %215 = vmatmul.mubr.f32.gmra.mrb[10].mxu1 %v40_v7 }
  0x39   :  { %179 = vmatprep.mubr.f32.mxu0 %v27_v8  ;;  %219 = vmatprep.mubr.f32.mxu1 %v43_v9 }
  0x3c   :  { %180 = vmatmul.mubr.f32.gmra.mrb[12].mxu0 %v26_v10  ;;  %220 = vmatmul.mubr.f32.gmra.mrb[12].mxu1 %v42_v11 }
  0x3d   :  { %184 = vmatprep.mubr.f32.mxu0 %v29_v12  ;;  %224 = vmatprep.mubr.f32.mxu1 %v45_v13 }
  0x40   :  { %185 = vmatmul.mubr.f32.gmra.mrb[14].mxu0 %v28_v14  ;;  %225 = vmatmul.mubr.f32.gmra.mrb[14].mxu1 %v44_v15 }
  0xf7   :  { %v331_v16 = vpop.f32.mrb[0].mxu0  ;;  %v355_v17 = vpop.f32.mrb[0].mxu1 }
  0xf8   :  { %v332_v19 = vpop.f32.mrb[1].mxu0  ;;  %v356_v20 = vpop.f32.mrb[1].mxu1 }
  0xf9   :  { %v333_v21 = vadd.f32 %v332_v19, %v331_v16  ;;  %v357_v22 = vadd.f32 %v356_v20, %v355_v17 }
  0xfb   :  { %v152_v23 = vadd.f32 %v333_v21, %v642_v18  ;;  %v192_v24 = vadd.f32 %v357_v22, %v642_v18  ;;  %v334_v25 = vpop.f32.mrb[2].mxu0  ;;  %v358_v26 = vpop.f32.mrb[2].mxu1 }
  0xfc   :  { %v335_v27 = vpop.f32.mrb[3].mxu0  ;;  %v359_v28 = vpop.f32.mrb[3].mxu1 }
  0xfd   :  { %vm230_vm0 = vcmp.ge.f32.partialorder %v152_v23, 0.0  ;;  %v246_v29 = vmul.f32 0.01, %v152_v23  ;;  %vm238_vm1 = vcmp.ge.f32.partialorder %v192_v24, 0.0  ;;  %v254_v30 = vmul.f32 0.01, %v192_v24 }
  0xfe   :  { %v336_v31 = vadd.f32 %v335_v27, %v334_v25  ;;  %v360_v32 = vadd.f32 %v359_v28, %v358_v26 }
  0xff   :  { %v262_v33 = vsel %vm230_vm0, %v152_v23, %v246_v29  ;;  %v270_v34 = vsel %vm238_vm1, %v192_v24, %v254_v30  ;;  %v337_v35 = vpop.f32.mrb[4].mxu0  ;;  %v361_v36 = vpop.f32.mrb[4].mxu1 }
 0x100   :  { %278 = vst [vmem:[%s711_s3] sm:$0xff] %v262_v33  ;;  %286 = vst [vmem:[%s711_s3 + $0x40] sm:$0xff] %v270_v34  ;;  %v157_v37 = vadd.f32 %v336_v31, %v642_v18  ;;  %v197_v38 = vadd.f32 %v360_v32, %v642_v18  ;;  %v338_v39 = vpop.f32.mrb[5].mxu0  ;;  %v362_v40 = vpop.f32.mrb[5].mxu1 }
 0x101   :  { %v339_v41 = vadd.f32 %v338_v39, %v337_v35  ;;  %v363_v42 = vadd.f32 %v362_v40, %v361_v36 }
 0x102   :  { %vm231_vm2 = vcmp.ge.f32.partialorder %v157_v37, 0.0  ;;  %v247_v43 = vmul.f32 0.01, %v157_v37  ;;  %vm239_vm3 = vcmp.ge.f32.partialorder %v197_v38, 0.0  ;;  %v255_v44 = vmul.f32 0.01, %v197_v38 }
 0x103   :  { %v162_v45 = vadd.f32 %v339_v41, %v642_v18  ;;  %v202_v46 = vadd.f32 %v363_v42, %v642_v18  ;;  %v340_v47 = vpop.f32.mrb[6].mxu0  ;;  %v364_v48 = vpop.f32.mrb[6].mxu1 }
 0x104   :  { %v263_v49 = vsel %vm231_vm2, %v157_v37, %v247_v43  ;;  %v271_v50 = vsel %vm239_vm3, %v197_v38, %v255_v44  ;;  %v341_v51 = vpop.f32.mrb[7].mxu0  ;;  %v365_v52 = vpop.f32.mrb[7].mxu1 }
 0x105   :  { %279 = vst [vmem:[%s711_s3 + $0x8] sm:$0xff] %v263_v49  ;;  %287 = vst [vmem:[%s711_s3 + $0x48] sm:$0xff] %v271_v50  ;;  %vm232_vm4 = vcmp.ge.f32.partialorder %v162_v45, 0.0  ;;  %v248_v53 = vmul.f32 0.01, %v162_v45  ;;  %vm240_vm5 = vcmp.ge.f32.partialorder %v202_v46, 0.0  ;;  %v342_v55 = vadd.f32 %v341_v51, %v340_v47 }
 0x106   :  { %v256_v54 = vmul.f32 0.01, %v202_v46  ;;  %v366_v56 = vadd.f32 %v365_v52, %v364_v48 }
 0x107   :  { %v264_v57 = vsel %vm232_vm4, %v162_v45, %v248_v53  ;;  %v343_v59 = vpop.f32.mrb[8].mxu0  ;;  %v367_v60 = vpop.f32.mrb[8].mxu1  ;;  %v167_v61 = vadd.f32 %v342_v55, %v642_v18 }
 0x108   :  { %v272_v58 = vsel %vm240_vm5, %v202_v46, %v256_v54  ;;  %280 = vst [vmem:[%s711_s3 + $0x10] sm:$0xff] %v264_v57  ;;  %v207_v62 = vadd.f32 %v366_v56, %v642_v18  ;;  %v344_v63 = vpop.f32.mrb[9].mxu0  ;;  %v368_v0 = vpop.f32.mrb[9].mxu1 }
 0x109   :  { %288 = vst [vmem:[%s711_s3 + $0x50] sm:$0xff] %v272_v58  ;;  %v345_v1 = vadd.f32 %v344_v63, %v343_v59  ;;  %v369_v2 = vadd.f32 %v368_v0, %v367_v60  ;;  %vm233_vm6 = vcmp.ge.f32.partialorder %v167_v61, 0.0  ;;  %v249_v3 = vmul.f32 0.01, %v167_v61 }
 0x10a   :  { %vm241_vm7 = vcmp.ge.f32.partialorder %v207_v62, 0.0  ;;  %v257_v4 = vmul.f32 0.01, %v207_v62 }
 0x10b   :  { %v172_v5 = vadd.f32 %v345_v1, %v642_v18  ;;  %v212_v6 = vadd.f32 %v369_v2, %v642_v18  ;;  %v346_v7 = vpop.f32.mrb[10].mxu0  ;;  %v370_v8 = vpop.f32.mrb[10].mxu1  ;;  %v265_v9 = vsel %vm233_vm6, %v167_v61, %v249_v3 }
 0x10c   :  { %v273_v10 = vsel %vm241_vm7, %v207_v62, %v257_v4  ;;  %v347_v11 = vpop.f32.mrb[11].mxu0  ;;  %v371_v12 = vpop.f32.mrb[11].mxu1  ;;  %281 = vst [vmem:[%s711_s3 + $0x18] sm:$0xff] %v265_v9 }
 0x10d   :  { %289 = vst [vmem:[%s711_s3 + $0x58] sm:$0xff] %v273_v10  ;;  %vm234_vm8 = vcmp.ge.f32.partialorder %v172_v5, 0.0  ;;  %v250_v13 = vmul.f32 0.01, %v172_v5  ;;  %vm242_vm9 = vcmp.ge.f32.partialorder %v212_v6, 0.0  ;;  %v348_v15 = vadd.f32 %v347_v11, %v346_v7 }
 0x10e   :  { %v258_v14 = vmul.f32 0.01, %v212_v6  ;;  %v372_v16 = vadd.f32 %v371_v12, %v370_v8 }
 0x10f   :  { %v266_v17 = vsel %vm234_vm8, %v172_v5, %v250_v13  ;;  %v349_v20 = vpop.f32.mrb[12].mxu0  ;;  %v373_v21 = vpop.f32.mrb[12].mxu1  ;;  %v177_v22 = vadd.f32 %v348_v15, %v642_v18 }
 0x110   :  { %v274_v19 = vsel %vm242_vm9, %v212_v6, %v258_v14  ;;  %282 = vst [vmem:[%s711_s3 + $0x20] sm:$0xff] %v266_v17  ;;  %v217_v23 = vadd.f32 %v372_v16, %v642_v18  ;;  %v350_v24 = vpop.f32.mrb[13].mxu0  ;;  %v374_v25 = vpop.f32.mrb[13].mxu1 }
 0x111   :  { %290 = vst [vmem:[%s711_s3 + $0x60] sm:$0xff] %v274_v19  ;;  %v351_v26 = vadd.f32 %v350_v24, %v349_v20  ;;  %v375_v27 = vadd.f32 %v374_v25, %v373_v21  ;;  %vm235_vm10 = vcmp.ge.f32.partialorder %v177_v22, 0.0  ;;  %v251_v28 = vmul.f32 0.01, %v177_v22 }
 0x112   :  { %vm243_vm11 = vcmp.ge.f32.partialorder %v217_v23, 0.0  ;;  %v259_v29 = vmul.f32 0.01, %v217_v23 }
 0x113   :  { %v182_v30 = vadd.f32 %v351_v26, %v642_v18  ;;  %v222_v31 = vadd.f32 %v375_v27, %v642_v18  ;;  %v352_v32 = vpop.f32.mrb[14].mxu0  ;;  %v376_v33 = vpop.f32.mrb[14].mxu1  ;;  %v267_v34 = vsel %vm235_vm10, %v177_v22, %v251_v28 }
 0x114   :  { %v275_v35 = vsel %vm243_vm11, %v217_v23, %v259_v29  ;;  %v353_v36 = vpop.f32.mrb[15].mxu0  ;;  %v377_v37 = vpop.f32.mrb[15].mxu1  ;;  %283 = vst [vmem:[%s711_s3 + $0x28] sm:$0xff] %v267_v34 }
 0x115   :  { %291 = vst [vmem:[%s711_s3 + $0x68] sm:$0xff] %v275_v35  ;;  %vm236_vm12 = vcmp.ge.f32.partialorder %v182_v30, 0.0  ;;  %v252_v38 = vmul.f32 0.01, %v182_v30  ;;  %vm244_vm13 = vcmp.ge.f32.partialorder %v222_v31, 0.0  ;;  %v354_v40 = vadd.f32 %v353_v36, %v352_v32 }
 0x116   :  { %v260_v39 = vmul.f32 0.01, %v222_v31  ;;  %v378_v41 = vadd.f32 %v377_v37, %v376_v33 }
 0x117   :  { %v268_v42 = vsel %vm236_vm12, %v182_v30, %v252_v38  ;;  %v187_v44 = vadd.f32 %v354_v40, %v642_v18 }
 0x118   :  { %v276_v43 = vsel %vm244_vm13, %v222_v31, %v260_v39  ;;  %284 = vst [vmem:[%s711_s3 + $0x30] sm:$0xff] %v268_v42  ;;  %v227_v45 = vadd.f32 %v378_v41, %v642_v18 }
 0x119   :  { %292 = vst [vmem:[%s711_s3 + $0x70] sm:$0xff] %v276_v43  ;;  %vm237_vm14 = vcmp.ge.f32.partialorder %v187_v44, 0.0  ;;  %v253_v46 = vmul.f32 0.01, %v187_v44 }
 0x11a   :  { %vm245_vm15 = vcmp.ge.f32.partialorder %v227_v45, 0.0  ;;  %v261_v47 = vmul.f32 0.01, %v227_v45 }
 0x11b   :  { %v269_v48 = vsel %vm237_vm14, %v187_v44, %v253_v46 }
 0x11c   :  { %v277_v49 = vsel %vm245_vm15, %v227_v45, %v261_v47  ;;  %285 = vst [vmem:[%s711_s3 + $0x38] sm:$0xff] %v269_v48 }
 0x11d   :  { %293 = vst [vmem:[%s711_s3 + $0x78] sm:$0xff] %v277_v49 }

// kernel: cnn_dqn_forward.5
= control target key start
LH: loop header
LB: loop body
LE: loop exit
PB: predicated region body
PF: predicated region fallthrough
CT: control target
= control target key end

     0   :  { %s680_s1 = inlined_call_operand.vmem [shape: f32[512,128], index: 1, kind: input, shape index: {}]   ;;  %s681_s0 = inlined_call_operand.vmem [shape: f32[24,512], index: 0, kind: input, shape index: {}]   ;;  %s682_s2 = inlined_call_operand.vmem [shape: f32[1,128], index: 2, kind: input, shape index: {}]   ;;  %s683_s3 = inlined_call_operand.vmem [shape: f32[24,128], index: 3, kind: output, shape index: {}]  }
   0x1   :  { %v42_v0 = vld [vmem:[%s680_s1 + $0x80] sm:$0xff]  ;;  %v43_v1 = vld [vmem:[%s680_s1 + $0x88] sm:$0xff]  ;;  %v44_v11 = vld [vmem:[%s680_s1 + $0x90] sm:$0xff] }
   0x2   :  { %v26_v2 = vld [vmem:[%s680_s1] sm:$0xff]  ;;  %v356_v3 = vpack.c.bf16 %v43_v1, %v42_v0  ;;  %v27_v4 = vld [vmem:[%s680_s1 + $0x8] sm:$0xff]  ;;  %v45_v13 = vld [vmem:[%s680_s1 + $0x98] sm:$0xff] }
   0x3   :  { %v74_v5 = vld [vmem:[%s680_s1 + $0x180] sm:$0xff]  ;;  %v75_v6 = vld [vmem:[%s680_s1 + $0x188] sm:$0xff]  ;;  %v358_v7 = vpack.c.bf16 %v27_v4, %v26_v2  ;;  %v28_v14 = vld [vmem:[%s680_s1 + $0x10] sm:$0xff]  ;;  %v360_v16 = vpack.c.bf16 %v45_v13, %v44_v11 }
   0x4   :  { %v388_v8 = vpack.c.bf16 %v75_v6, %v74_v5  ;;  %v58_v9 = vld [vmem:[%s680_s1 + $0x100] sm:$0xff]  ;;  %v59_v10 = vld [vmem:[%s680_s1 + $0x108] sm:$0xff]  ;;  %357 = vmatprep.subr.bf16.mxu0 %v356_v3  ;;  %v29_v15 = vld [vmem:[%s680_s1 + $0x18] sm:$0xff] }
   0x5   :  { %v390_v12 = vpack.c.bf16 %v59_v10, %v58_v9  ;;  %359 = vmatpush3.bf16.msra.mxu0 %v358_v7  ;;  %v362_v17 = vpack.c.bf16 %v29_v15, %v28_v14  ;;  %v76_v18 = vld [vmem:[%s680_s1 + $0x190] sm:$0xff]  ;;  %v77_v19 = vld [vmem:[%s680_s1 + $0x198] sm:$0xff]  ;;  %v46_v23 = vld [vmem:[%s680_s1 + $0xa0] sm:$0xff] }
   0x6   :  { %389 = vmatprep.subr.bf16.mxu1 %v388_v8  ;;  %v60_v20 = vld [vmem:[%s680_s1 + $0x110] sm:$0xff]  ;;  %v392_v21 = vpack.c.bf16 %v77_v19, %v76_v18  ;;  %v61_v22 = vld [vmem:[%s680_s1 + $0x118] sm:$0xff]  ;;  %v47_v24 = vld [vmem:[%s680_s1 + $0xa8] sm:$0xff]  ;;  %361 = vmatprep.subr.bf16.mxu0 %v360_v16 }
   0x7   :  { %391 = vmatpush3.bf16.msra.mxu1 %v390_v12  ;;  %v394_v25 = vpack.c.bf16 %v61_v22, %v60_v20  ;;  %v364_v26 = vpack.c.bf16 %v47_v24, %v46_v23  ;;  %v30_v27 = vld [vmem:[%s680_s1 + $0x20] sm:$0xff]  ;;  %v31_v28 = vld [vmem:[%s680_s1 + $0x28] sm:$0xff]  ;;  %v48_v35 = vld [vmem:[%s680_s1 + $0xb0] sm:$0xff] }
   0x8   :  { %v78_v29 = vld [vmem:[%s680_s1 + $0x1a0] sm:$0xff]  ;;  %393 = vmatprep.subr.bf16.mxu1 %v392_v21  ;;  %v79_v30 = vld [vmem:[%s680_s1 + $0x1a8] sm:$0xff]  ;;  %v366_v33 = vpack.c.bf16 %v31_v28, %v30_v27  ;;  %v49_v36 = vld [vmem:[%s680_s1 + $0xb8] sm:$0xff] }
   0x9   :  { %v62_v31 = vld [vmem:[%s680_s1 + $0x120] sm:$0xff]  ;;  %v63_v32 = vld [vmem:[%s680_s1 + $0x128] sm:$0xff]  ;;  %363 = vmatpush3.bf16.msra.mxu0 %v362_v17  ;;  %v396_v34 = vpack.c.bf16 %v79_v30, %v78_v29  ;;  %v32_v37 = vld [vmem:[%s680_s1 + $0x30] sm:$0xff]  ;;  %v368_v39 = vpack.c.bf16 %v49_v36, %v48_v35 }
   0xa   :  { %365 = vmatprep.subr.bf16.mxu0 %v364_v26  ;;  %v398_v38 = vpack.c.bf16 %v63_v32, %v62_v31  ;;  %v33_v40 = vld [vmem:[%s680_s1 + $0x38] sm:$0xff]  ;;  %v80_v41 = vld [vmem:[%s680_s1 + $0x1b0] sm:$0xff]  ;;  %v50_v46 = vld [vmem:[%s680_s1 + $0xc0] sm:$0xff] }
   0xb   :  { %395 = vmatpush3.bf16.msra.mxu1 %v394_v25  ;;  %v81_v42 = vld [vmem:[%s680_s1 + $0x1b8] sm:$0xff]  ;;  %v64_v44 = vld [vmem:[%s680_s1 + $0x130] sm:$0xff]  ;;  %v51_v47 = vld [vmem:[%s680_s1 + $0xc8] sm:$0xff]  ;;  %v370_v48 = vpack.c.bf16 %v33_v40, %v32_v37 }
   0xc   :  { %397 = vmatprep.subr.bf16.mxu1 %v396_v34  ;;  %v400_v43 = vpack.c.bf16 %v81_v42, %v80_v41  ;;  %v65_v45 = vld [vmem:[%s680_s1 + $0x138] sm:$0xff]  ;;  %v82_v49 = vld [vmem:[%s680_s1 + $0x1c0] sm:$0xff]  ;;  %v83_v50 = vld [vmem:[%s680_s1 + $0x1c8] sm:$0xff]  ;;  %v372_v52 = vpack.c.bf16 %v51_v47, %v50_v46 }
   0xd   :  { %367 = vmatpush3.bf16.msra.mxu0 %v366_v33  ;;  %v402_v51 = vpack.c.bf16 %v65_v45, %v64_v44  ;;  %v34_v53 = vld [vmem:[%s680_s1 + $0x40] sm:$0xff]  ;;  %v35_v54 = vld [vmem:[%s680_s1 + $0x48] sm:$0xff]  ;;  %v404_v56 = vpack.c.bf16 %v83_v50, %v82_v49  ;;  %v52_v58 = vld [vmem:[%s680_s1 + $0xd0] sm:$0xff] }
   0xe   :  { %369 = vmatprep.subr.bf16.mxu0 %v368_v39  ;;  %v66_v55 = vld [vmem:[%s680_s1 + $0x140] sm:$0xff]  ;;  %v67_v57 = vld [vmem:[%s680_s1 + $0x148] sm:$0xff]  ;;  %v53_v59 = vld [vmem:[%s680_s1 + $0xd8] sm:$0xff]  ;;  %v374_v62 = vpack.c.bf16 %v35_v54, %v34_v53 }
   0xf   :  { %399 = vmatpush3.bf16.msra.mxu1 %v398_v38  ;;  %v84_v60 = vld [vmem:[%s680_s1 + $0x1d0] sm:$0xff]  ;;  %v85_v61 = vld [vmem:[%s680_s1 + $0x1d8] sm:$0xff]  ;;  %v406_v63 = vpack.c.bf16 %v67_v57, %v66_v55  ;;  %v376_v0 = vpack.c.bf16 %v53_v59, %v52_v58  ;;  %v54_v6 = vld [vmem:[%s680_s1 + $0xe0] sm:$0xff] }
  0x10   :  { %401 = vmatprep.subr.bf16.mxu1 %v400_v43  ;;  %v36_v1 = vld [vmem:[%s680_s1 + $0x50] sm:$0xff]  ;;  %v37_v2 = vld [vmem:[%s680_s1 + $0x58] sm:$0xff]  ;;  %v408_v4 = vpack.c.bf16 %v85_v61, %v84_v60  ;;  %v55_v7 = vld [vmem:[%s680_s1 + $0xe8] sm:$0xff] }
  0x11   :  { %371 = vmatpush3.bf16.msra.mxu0 %v370_v48  ;;  %v68_v3 = vld [vmem:[%s680_s1 + $0x150] sm:$0xff]  ;;  %v69_v5 = vld [vmem:[%s680_s1 + $0x158] sm:$0xff]  ;;  %v86_v8 = vld [vmem:[%s680_s1 + $0x1e0] sm:$0xff]  ;;  %v378_v10 = vpack.c.bf16 %v37_v2, %v36_v1  ;;  %v380_v14 = vpack.c.bf16 %v55_v7, %v54_v6 }
  0x12   :  { %373 = vmatprep.subr.bf16.mxu0 %v372_v52  ;;  %v87_v9 = vld [vmem:[%s680_s1 + $0x1e8] sm:$0xff]  ;;  %v38_v11 = vld [vmem:[%s680_s1 + $0x60] sm:$0xff]  ;;  %v410_v13 = vpack.c.bf16 %v69_v5, %v68_v3  ;;  %v56_v19 = vld [vmem:[%s680_s1 + $0xf0] sm:$0xff] }
  0x13   :  { %403 = vmatpush3.bf16.msra.mxu1 %v402_v51  ;;  %v39_v12 = vld [vmem:[%s680_s1 + $0x68] sm:$0xff]  ;;  %v70_v15 = vld [vmem:[%s680_s1 + $0x160] sm:$0xff]  ;;  %v412_v18 = vpack.c.bf16 %v87_v9, %v86_v8  ;;  %v57_v20 = vld [vmem:[%s680_s1 + $0xf8] sm:$0xff] }
  0x14   :  { %405 = vmatprep.subr.bf16.mxu1 %v404_v56  ;;  %v71_v16 = vld [vmem:[%s680_s1 + $0x168] sm:$0xff]  ;;  %v17_v21 = vld [vmem:[%s681_s0 + $0x18] sm:$0xff]  ;;  %v88_v22 = vld [vmem:[%s680_s1 + $0x1f0] sm:$0xff]  ;;  %v382_v24 = vpack.c.bf16 %v39_v12, %v38_v11  ;;  %v384_v26 = vpack.c.bf16 %v57_v20, %v56_v19 }
  0x15   :  { %375 = vmatpush3.bf16.msra.mxu0 %v374_v62  ;;  %v15_v17 = vld [vmem:[%s681_s0 + $0x8] sm:$0xff]  ;;  %v89_v23 = vld [vmem:[%s680_s1 + $0x1f8] sm:$0xff]  ;;  %241 = vmatprep.mubr.f32.mxu1 %v17_v21  ;;  %v414_v25 = vpack.c.bf16 %v71_v16, %v70_v15  ;;  %v40_v27 = vld [vmem:[%s680_s1 + $0x70] sm:$0xff] }
  0x16   :  { %377 = vmatprep.subr.bf16.mxu0 %v376_v0  ;;  %161 = vmatprep.mubr.f32.mxu0 %v15_v17  ;;  %v41_v28 = vld [vmem:[%s680_s1 + $0x78] sm:$0xff]  ;;  %v416_v29 = vpack.c.bf16 %v89_v23, %v88_v22  ;;  %v72_v30 = vld [vmem:[%s680_s1 + $0x170] sm:$0xff]  ;;  %v14_v34 = vld [vmem:[%s681_s0] sm:$0xff] }
  0x17   :  { %407 = vmatpush3.bf16.msra.mxu1 %v406_v63  ;;  %v73_v31 = vld [vmem:[%s680_s1 + $0x178] sm:$0xff]  ;;  %v386_v32 = vpack.c.bf16 %v41_v28, %v40_v27  ;;  %v16_v35 = vld [vmem:[%s681_s0 + $0x10] sm:$0xff]  ;;  %v19_v36 = vld [vmem:[%s681_s0 + $0x28] sm:$0xff] }
  0x18   :  { %409 = vmatprep.subr.bf16.mxu1 %v408_v4  ;;  %v418_v33 = vpack.c.bf16 %v73_v31, %v72_v30  ;;  %v21_v37 = vld [vmem:[%s681_s0 + $0x38] sm:$0xff]  ;;  %v18_v38 = vld [vmem:[%s681_s0 + $0x20] sm:$0xff]  ;;  %v20_v39 = vld [vmem:[%s681_s0 + $0x30] sm:$0xff] }
  0x19   :  { %379 = vmatpush3.bf16.msra.mxu0 %v378_v10  ;;  %v23_v40 = vld [vmem:[%s681_s0 + $0x48] sm:$0xff]  ;;  %v25_v41 = vld [vmem:[%s681_s0 + $0x58] sm:$0xff]  ;;  %v22_v42 = vld [vmem:[%s681_s0 + $0x40] sm:$0xff] }
  0x1a   :  { %381 = vmatprep.subr.bf16.mxu0 %v380_v14  ;;  %v24_v43 = vld [vmem:[%s681_s0 + $0x50] sm:$0xff]  ;;  %v273_v45 = vld [vmem:[%s682_s2] ss:$0 sm:$0xff] }
  0x1b   :  { %411 = vmatpush3.bf16.msra.mxu1 %v410_v13 }
  0x1c   :  { %413 = vmatprep.subr.bf16.mxu1 %v412_v18 }
  0x1d   :  { %383 = vmatpush3.bf16.msra.mxu0 %v382_v24 }
  0x1e   :  { %385 = vmatprep.subr.bf16.mxu0 %v384_v26 }
  0x1f   :  { %415 = vmatpush3.bf16.msra.mxu1 %v414_v25 }
  0x20   :  { %417 = vmatprep.subr.bf16.mxu1 %v416_v29 }
  0x21   :  { %387 = vmatpush3.bf16.msra.mxu0 %v386_v32 }
  0x23   :  { %419 = vmatpush3.bf16.msra.mxu1 %v418_v33 }
  0x24   :  { %162 = vmatmul.mubr.f32.vlgmr.msra.gmra.mrb[0].mxu0 %v14_v34 }
  0x25   :  { %166 = vmatprep.mubr.f32.mxu0 %v19_v36 }
  0x26   :  { %242 = vmatmul.mubr.f32.vlgmr.msra.gmra.mrb[0].mxu1 %v16_v35 }
  0x27   :  { %246 = vmatprep.mubr.f32.mxu1 %v21_v37 }
  0x28   :  { %167 = vmatmul.mubr.f32.gmra.mrb[2].mxu0 %v18_v38 }
  0x29   :  { %171 = vmatprep.mubr.f32.mxu0 %v23_v40 }
  0x2a   :  { %247 = vmatmul.mubr.f32.gmra.mrb[2].mxu1 %v20_v39 }
  0x2b   :  { %251 = vmatprep.mubr.f32.mxu1 %v25_v41 }
  0x2c   :  { %172 = vmatmul.mubr.f32.gmra.mrb[4].mxu0 %v22_v42 }
  0x2e   :  { %252 = vmatmul.mubr.f32.gmra.mrb[4].mxu1 %v24_v43 }
  0xf7   :  { %v306_v44 = vpop.f32.mrb[0].mxu0 }
  0xf8   :  { %v307_v46 = vpop.f32.mrb[1].mxu0 }
  0xf9   :  { %v347_v47 = vpop.f32.mrb[0].mxu1  ;;  %v308_v48 = vadd.f32 %v307_v46, %v306_v44 }
  0xfa   :  { %v348_v49 = vpop.f32.mrb[1].mxu1 }
  0xfb   :  { %v349_v50 = vadd.f32 %v348_v49, %v347_v47  ;;  %v164_v51 = vadd.f32 %v308_v48, %v273_v45  ;;  %v309_v52 = vpop.f32.mrb[2].mxu0 }
  0xfc   :  { %v310_v53 = vpop.f32.mrb[3].mxu0 }
  0xfd   :  { %v350_v54 = vpop.f32.mrb[2].mxu1  ;;  %v244_v55 = vadd.f32 %v349_v50, %v164_v51  ;;  %v311_v56 = vadd.f32 %v310_v53, %v309_v52 }
  0xfe   :  { %v351_v57 = vpop.f32.mrb[3].mxu1 }
  0xff   :  { %v352_v58 = vadd.f32 %v351_v57, %v350_v54  ;;  %vm257_vm0 = vcmp.ge.f32.partialorder %v244_v55, 0.0  ;;  %v260_v59 = vmul.f32 0.01, %v244_v55  ;;  %v169_v60 = vadd.f32 %v311_v56, %v273_v45  ;;  %v312_v61 = vpop.f32.mrb[4].mxu0 }
 0x100   :  { %v313_v62 = vpop.f32.mrb[5].mxu0 }
 0x101   :  { %v353_v63 = vpop.f32.mrb[4].mxu1  ;;  %v263_v0 = vsel %vm257_vm0, %v244_v55, %v260_v59  ;;  %v249_v1 = vadd.f32 %v352_v58, %v169_v60  ;;  %v314_v2 = vadd.f32 %v313_v62, %v312_v61 }
 0x102   :  { %v354_v3 = vpop.f32.mrb[5].mxu1  ;;  %266 = vst [vmem:[%s683_s3] sm:$0xff] %v263_v0 }
 0x103   :  { %v355_v4 = vadd.f32 %v354_v3, %v353_v63  ;;  %vm258_vm1 = vcmp.ge.f32.partialorder %v249_v1, 0.0  ;;  %v261_v5 = vmul.f32 0.01, %v249_v1  ;;  %v174_v6 = vadd.f32 %v314_v2, %v273_v45 }
 0x105   :  { %v264_v7 = vsel %vm258_vm1, %v249_v1, %v261_v5  ;;  %v254_v8 = vadd.f32 %v355_v4, %v174_v6 }
 0x106   :  { %267 = vst [vmem:[%s683_s3 + $0x8] sm:$0xff] %v264_v7 }
 0x107   :  { %vm259_vm2 = vcmp.ge.f32.partialorder %v254_v8, 0.0  ;;  %v262_v9 = vmul.f32 0.01, %v254_v8 }
 0x109   :  { %v265_v10 = vsel %vm259_vm2, %v254_v8, %v262_v9 }
 0x10a   :  { %268 = vst [vmem:[%s683_s3 + $0x10] sm:$0xff] %v265_v10 }

// kernel: cnn_dqn_forward.6
= control target key start
LH: loop header
LB: loop body
LE: loop exit
PB: predicated region body
PF: predicated region fallthrough
CT: control target
= control target key end

     0   :  { %vm500_vm0 = vmmov 0   ;;  %vm98_vm1 = vcmask 523264   ;;  %s759_s1 = inlined_call_operand.vmem [shape: f32[576,128], index: 1, kind: input, shape index: {}]   ;;  %s760_s0 = inlined_call_operand.vmem [shape: f32[8,576], index: 0, kind: input, shape index: {}]   ;;  %s761_s2 = inlined_call_operand.vmem [shape: f32[1,128], index: 2, kind: input, shape index: {}]   ;;  %s762_s3 = inlined_call_operand.vmem [shape: f32[8,128], index: 3, kind: output, shape index: {}]  }
   0x1   :  { %v35_v0 = vld [vmem:[%s759_s1 + $0x80] sm:$0xff]  ;;  %v36_v1 = vld [vmem:[%s759_s1 + $0x88] sm:$0xff]  ;;  %v37_v11 = vld [vmem:[%s759_s1 + $0x90] sm:$0xff] }
   0x2   :  { %v19_v2 = vld [vmem:[%s759_s1] sm:$0xff]  ;;  %v420_v3 = vpack.c.bf16 %v36_v1, %v35_v0  ;;  %v20_v4 = vld [vmem:[%s759_s1 + $0x8] sm:$0xff]  ;;  %v38_v13 = vld [vmem:[%s759_s1 + $0x98] sm:$0xff] }
   0x3   :  { %v67_v5 = vld [vmem:[%s759_s1 + $0x180] sm:$0xff]  ;;  %v68_v6 = vld [vmem:[%s759_s1 + $0x188] sm:$0xff]  ;;  %v422_v7 = vpack.c.bf16 %v20_v4, %v19_v2  ;;  %v21_v14 = vld [vmem:[%s759_s1 + $0x10] sm:$0xff]  ;;  %v424_v16 = vpack.c.bf16 %v38_v13, %v37_v11 }
   0x4   :  { %v452_v8 = vpack.c.bf16 %v68_v6, %v67_v5  ;;  %v51_v9 = vld [vmem:[%s759_s1 + $0x100] sm:$0xff]  ;;  %v52_v10 = vld [vmem:[%s759_s1 + $0x108] sm:$0xff]  ;;  %421 = vmatprep.subr.bf16.mxu0 %v420_v3  ;;  %v22_v15 = vld [vmem:[%s759_s1 + $0x18] sm:$0xff] }
   0x5   :  { %v454_v12 = vpack.c.bf16 %v52_v10, %v51_v9  ;;  %423 = vmatpush3.bf16.msra.mxu0 %v422_v7  ;;  %v426_v17 = vpack.c.bf16 %v22_v15, %v21_v14  ;;  %v69_v18 = vld [vmem:[%s759_s1 + $0x190] sm:$0xff]  ;;  %v70_v19 = vld [vmem:[%s759_s1 + $0x198] sm:$0xff]  ;;  %v39_v23 = vld [vmem:[%s759_s1 + $0xa0] sm:$0xff] }
   0x6   :  { %453 = vmatprep.subr.bf16.mxu1 %v452_v8  ;;  %v53_v20 = vld [vmem:[%s759_s1 + $0x110] sm:$0xff]  ;;  %v456_v21 = vpack.c.bf16 %v70_v19, %v69_v18  ;;  %v54_v22 = vld [vmem:[%s759_s1 + $0x118] sm:$0xff]  ;;  %v40_v24 = vld [vmem:[%s759_s1 + $0xa8] sm:$0xff]  ;;  %425 = vmatprep.subr.bf16.mxu0 %v424_v16 }
   0x7   :  { %455 = vmatpush3.bf16.msra.mxu1 %v454_v12  ;;  %v458_v25 = vpack.c.bf16 %v54_v22, %v53_v20  ;;  %v428_v26 = vpack.c.bf16 %v40_v24, %v39_v23  ;;  %v23_v27 = vld [vmem:[%s759_s1 + $0x20] sm:$0xff]  ;;  %v24_v28 = vld [vmem:[%s759_s1 + $0x28] sm:$0xff]  ;;  %v41_v35 = vld [vmem:[%s759_s1 + $0xb0] sm:$0xff] }
   0x8   :  { %v71_v29 = vld [vmem:[%s759_s1 + $0x1a0] sm:$0xff]  ;;  %457 = vmatprep.subr.bf16.mxu1 %v456_v21  ;;  %v72_v30 = vld [vmem:[%s759_s1 + $0x1a8] sm:$0xff]  ;;  %v430_v33 = vpack.c.bf16 %v24_v28, %v23_v27  ;;  %v42_v36 = vld [vmem:[%s759_s1 + $0xb8] sm:$0xff] }
   0x9   :  { %v55_v31 = vld [vmem:[%s759_s1 + $0x120] sm:$0xff]  ;;  %v56_v32 = vld [vmem:[%s759_s1 + $0x128] sm:$0xff]  ;;  %427 = vmatpush3.bf16.msra.mxu0 %v426_v17  ;;  %v460_v34 = vpack.c.bf16 %v72_v30, %v71_v29  ;;  %v25_v37 = vld [vmem:[%s759_s1 + $0x30] sm:$0xff]  ;;  %v432_v39 = vpack.c.bf16 %v42_v36, %v41_v35 }
   0xa   :  { %429 = vmatprep.subr.bf16.mxu0 %v428_v26  ;;  %v462_v38 = vpack.c.bf16 %v56_v32, %v55_v31  ;;  %v26_v40 = vld [vmem:[%s759_s1 + $0x38] sm:$0xff]  ;;  %v73_v41 = vld [vmem:[%s759_s1 + $0x1b0] sm:$0xff]  ;;  %v43_v46 = vld [vmem:[%s759_s1 + $0xc0] sm:$0xff] }
   0xb   :  { %459 = vmatpush3.bf16.msra.mxu1 %v458_v25  ;;  %v74_v42 = vld [vmem:[%s759_s1 + $0x1b8] sm:$0xff]  ;;  %v57_v44 = vld [vmem:[%s759_s1 + $0x130] sm:$0xff]  ;;  %v44_v47 = vld [vmem:[%s759_s1 + $0xc8] sm:$0xff]  ;;  %v434_v48 = vpack.c.bf16 %v26_v40, %v25_v37 }
   0xc   :  { %461 = vmatprep.subr.bf16.mxu1 %v460_v34  ;;  %v464_v43 = vpack.c.bf16 %v74_v42, %v73_v41  ;;  %v58_v45 = vld [vmem:[%s759_s1 + $0x138] sm:$0xff]  ;;  %v75_v49 = vld [vmem:[%s759_s1 + $0x1c0] sm:$0xff]  ;;  %v76_v50 = vld [vmem:[%s759_s1 + $0x1c8] sm:$0xff]  ;;  %v436_v52 = vpack.c.bf16 %v44_v47, %v43_v46 }
   0xd   :  { %431 = vmatpush3.bf16.msra.mxu0 %v430_v33  ;;  %v466_v51 = vpack.c.bf16 %v58_v45, %v57_v44  ;;  %v27_v53 = vld [vmem:[%s759_s1 + $0x40] sm:$0xff]  ;;  %v28_v54 = vld [vmem:[%s759_s1 + $0x48] sm:$0xff]  ;;  %v468_v56 = vpack.c.bf16 %v76_v50, %v75_v49  ;;  %v45_v58 = vld [vmem:[%s759_s1 + $0xd0] sm:$0xff]  ;;  %v501_v45 = vmov 0.0  }
   0xe   :  { %433 = vmatprep.subr.bf16.mxu0 %v432_v39  ;;  %v59_v55 = vld [vmem:[%s759_s1 + $0x140] sm:$0xff]  ;;  %v60_v57 = vld [vmem:[%s759_s1 + $0x148] sm:$0xff]  ;;  %v46_v59 = vld [vmem:[%s759_s1 + $0xd8] sm:$0xff]  ;;  %v438_v62 = vpack.c.bf16 %v28_v54, %v27_v53 }
   0xf   :  { %463 = vmatpush3.bf16.msra.mxu1 %v462_v38  ;;  %v77_v60 = vld [vmem:[%s759_s1 + $0x1d0] sm:$0xff]  ;;  %v78_v61 = vld [vmem:[%s759_s1 + $0x1d8] sm:$0xff]  ;;  %v470_v63 = vpack.c.bf16 %v60_v57, %v59_v55  ;;  %v440_v0 = vpack.c.bf16 %v46_v59, %v45_v58  ;;  %v47_v6 = vld [vmem:[%s759_s1 + $0xe0] sm:$0xff]  ;;  %v499_v38 = vmov 0.0|0.0  }
  0x10   :  { %465 = vmatprep.subr.bf16.mxu1 %v464_v43  ;;  %v29_v1 = vld [vmem:[%s759_s1 + $0x50] sm:$0xff]  ;;  %v30_v2 = vld [vmem:[%s759_s1 + $0x58] sm:$0xff]  ;;  %v472_v4 = vpack.c.bf16 %v78_v61, %v77_v60  ;;  %v48_v7 = vld [vmem:[%s759_s1 + $0xe8] sm:$0xff] }
  0x11   :  { %435 = vmatpush3.bf16.msra.mxu0 %v434_v48  ;;  %v61_v3 = vld [vmem:[%s759_s1 + $0x150] sm:$0xff]  ;;  %v62_v5 = vld [vmem:[%s759_s1 + $0x158] sm:$0xff]  ;;  %v79_v8 = vld [vmem:[%s759_s1 + $0x1e0] sm:$0xff]  ;;  %v442_v10 = vpack.c.bf16 %v30_v2, %v29_v1  ;;  %v444_v14 = vpack.c.bf16 %v48_v7, %v47_v6 }
  0x12   :  { %437 = vmatprep.subr.bf16.mxu0 %v436_v52  ;;  %v80_v9 = vld [vmem:[%s759_s1 + $0x1e8] sm:$0xff]  ;;  %v31_v11 = vld [vmem:[%s759_s1 + $0x60] sm:$0xff]  ;;  %v474_v13 = vpack.c.bf16 %v62_v5, %v61_v3  ;;  %v49_v19 = vld [vmem:[%s759_s1 + $0xf0] sm:$0xff] }
  0x13   :  { %467 = vmatpush3.bf16.msra.mxu1 %v466_v51  ;;  %v15_v12 = vld [vmem:[%s760_s0 + $0x8] sm:$0xff]  ;;  %v63_v16 = vld [vmem:[%s759_s1 + $0x160] sm:$0xff]  ;;  %v476_v18 = vpack.c.bf16 %v80_v9, %v79_v8  ;;  %v50_v20 = vld [vmem:[%s759_s1 + $0xf8] sm:$0xff] }
  0x14   :  { %469 = vmatprep.subr.bf16.mxu1 %v468_v56  ;;  %v32_v15 = vld [vmem:[%s759_s1 + $0x68] sm:$0xff]  ;;  %166 = vmatprep.mubr.f32.mxu0 %v15_v12  ;;  %v17_v21 = vld [vmem:[%s760_s0 + $0x18] sm:$0xff]  ;;  %v81_v22 = vld [vmem:[%s759_s1 + $0x1f0] sm:$0xff]  ;;  %v448_v26 = vpack.c.bf16 %v50_v20, %v49_v19 }
  0x15   :  { %439 = vmatpush3.bf16.msra.mxu0 %v438_v62  ;;  %v64_v17 = vld [vmem:[%s759_s1 + $0x168] sm:$0xff]  ;;  %v82_v23 = vld [vmem:[%s759_s1 + $0x1f8] sm:$0xff]  ;;  %236 = vmatprep.mubr.f32.mxu1 %v17_v21  ;;  %v446_v24 = vpack.c.bf16 %v32_v15, %v31_v11  ;;  %v33_v27 = vld [vmem:[%s759_s1 + $0x70] sm:$0xff] }
  0x16   :  { %441 = vmatprep.subr.bf16.mxu0 %v440_v0  ;;  %v478_v25 = vpack.c.bf16 %v64_v17, %v63_v16  ;;  %v34_v28 = vld [vmem:[%s759_s1 + $0x78] sm:$0xff]  ;;  %v480_v29 = vpack.c.bf16 %v82_v23, %v81_v22  ;;  %v65_v30 = vld [vmem:[%s759_s1 + $0x170] sm:$0xff]  ;;  %v83_v34 = vld [vmem:[%s759_s1 + $0x200] sm:$0xff] }
  0x17   :  { %471 = vmatpush3.bf16.msra.mxu1 %v470_v63  ;;  %v66_v31 = vld [vmem:[%s759_s1 + $0x178] sm:$0xff]  ;;  %v450_v32 = vpack.c.bf16 %v34_v28, %v33_v27  ;;  %v84_v35 = vld [vmem:[%s759_s1 + $0x208] sm:$0xff]  ;;  %v14_v36 = vld [vmem:[%s760_s0] sm:$0xff] }
  0x18   :  { %473 = vmatprep.subr.bf16.mxu1 %v472_v4  ;;  %v482_v33 = vpack.c.bf16 %v66_v31, %v65_v30  ;;  %v485_v37 = vpack.c.bf16 %v84_v35, %v83_v34  ;;  %v16_v39 = vld [vmem:[%s760_s0 + $0x10] sm:$0xff]  ;;  %v86_v41 = vld [vmem:[%s759_s1 + $0x218] sm:$0xff]  ;;  %v87_v43 = vld [vmem:[%s759_s1 + $0x220] sm:$0xff] }
  0x19   :  { %443 = vmatpush3.bf16.msra.mxu0 %v442_v10  ;;  %v85_v40 = vld [vmem:[%s759_s1 + $0x210] sm:$0xff]  ;;  %v88_v44 = vld [vmem:[%s759_s1 + $0x228] sm:$0xff]  ;;  %v90_v48 = vld [vmem:[%s759_s1 + $0x238] sm:$0xff] }
  0x1a   :  { %445 = vmatprep.subr.bf16.mxu0 %v444_v14  ;;  %v488_v42 = vpack.c.bf16 %v86_v41, %v85_v40  ;;  %v491_v46 = vpack.c.bf16 %v88_v44, %v87_v43  ;;  %v89_v47 = vld [vmem:[%s759_s1 + $0x230] sm:$0xff]  ;;  %v18_v50 = vld [vmem:[%s760_s0 + $0x20] sm:$0xff] }
  0x1b   :  { %475 = vmatpush3.bf16.msra.mxu1 %v474_v13  ;;  %v494_v49 = vpack.c.bf16 %v90_v48, %v89_v47  ;;  %v320_v52 = vld [vmem:[%s761_s2] ss:$0 sm:$0xff] }
  0x1c   :  { %477 = vmatprep.subr.bf16.mxu1 %v476_v18 }
  0x1d   :  { %447 = vmatpush3.bf16.msra.mxu0 %v446_v24 }
  0x1e   :  { %449 = vmatprep.subr.bf16.mxu0 %v448_v26 }
  0x1f   :  { %479 = vmatpush3.bf16.msra.mxu1 %v478_v25 }
  0x20   :  { %481 = vmatprep.subr.bf16.mxu1 %v480_v29 }
  0x21   :  { %451 = vmatpush3.bf16.msra.mxu0 %v450_v32 }
  0x22   :  { %484 = vmatprep.subr.bf16.mxu0 %v499_v38 }
  0x23   :  { %483 = vmatpush3.bf16.msra.mxu1 %v482_v33 }
  0x24   :  { %167 = vmatmul.mubr.f32.vlgmr.msra.gmra.mrb[0].mxu0 %v14_v36 }
  0x25   :  { %486 = vmatpush3.bf16.msra.mxu0 %v485_v37  ;;  %417 = vmatprep.mubr.msk.f32.mxu0 %vm500_vm0, %v501_v45 }
  0x26   :  { %237 = vmatmul.mubr.f32.vlgmr.msra.gmra.mrb[0].mxu1 %v16_v39  ;;  %487 = vmatprep.subr.bf16.mxu0 %v499_v38 }
  0x29   :  { %489 = vmatpush3.bf16.msra.mxu0 %v488_v42 }
  0x2a   :  { %490 = vmatprep.subr.bf16.mxu0 %v499_v38 }
  0x2d   :  { %492 = vmatpush3.bf16.msra.mxu0 %v491_v46 }
  0x2e   :  { %493 = vmatprep.subr.bf16.mxu0 %v499_v38 }
  0x31   :  { %495 = vmatpush3.bf16.msra.mxu0 %v494_v49 }
  0x34   :  { %418 = vmatmul.mubr.msk.f32.vlgmr.msra.gmra.mrb[2].mxu0 %vm98_vm1, %v18_v50 }
  0xf7   :  { %v354_v51 = vpop.f32.mrb[0].mxu0 }
  0xf8   :  { %v355_v53 = vpop.f32.mrb[1].mxu0 }
  0xf9   :  { %v389_v54 = vpop.f32.mrb[0].mxu1  ;;  %v356_v55 = vadd.f32 %v355_v53, %v354_v51 }
  0xfa   :  { %v390_v56 = vpop.f32.mrb[1].mxu1 }
  0xfb   :  { %v391_v57 = vadd.f32 %v390_v56, %v389_v54  ;;  %v169_v58 = vadd.f32 %v356_v55, %v320_v52 }
  0xfd   :  { %v239_v59 = vadd.f32 %v391_v57, %v169_v58 }
 0x107   :  { %v308_v60 = vpop.f32.mrb[2].mxu0 }
 0x108   :  { %v309_v61 = vadd.f32 %v308_v60, %v239_v59  ;;  %v419_v62 = vpop.f32.mrb[3].mxu0 }
 0x10a   :  { %vm312_vm2 = vcmp.ge.f32.partialorder %v309_v61, 0.0  ;;  %v313_v63 = vmul.f32 0.01, %v309_v61 }
 0x10c   :  { %v314_v0 = vsel %vm312_vm2, %v309_v61, %v313_v63 }
 0x10d   :  { %315 = vst [vmem:[%s762_s3] sm:$0xff] %v314_v0 }

// kernel: cnn_dqn_forward.7
= control target key start
LH: loop header
LB: loop body
LE: loop exit
PB: predicated region body
PF: predicated region fallthrough
CT: control target
= control target key end

     0   :  { %v619_v3 = vmov 0.0   ;;  %vm75_vm0 = vcmask 523264   ;;  %s952_s1 = inlined_call_operand.vmem [shape: f32[64,512], index: 1, kind: input, shape index: {}]   ;;  %s953_s3 = inlined_call_operand.vmem [shape: f32[512,128], index: 3, kind: input, shape index: {}]   ;;  %s954_s0 = inlined_call_operand.vmem [shape: f32[8,64], index: 0, kind: input, shape index: {}]   ;;  %s955_s2 = inlined_call_operand.vmem [shape: f32[1,512], index: 2, kind: input, shape index: {}]   ;;  %s956_s4 = inlined_call_operand.vmem [shape: f32[1,128], index: 4, kind: input, shape index: {}]   ;;  %s957_s5 = inlined_call_operand.vmem [shape: f32[8,128], index: 5, kind: output, shape index: {}]  }
   0x1   :  { %v22_v0 = vld [vmem:[%s952_s1 + $0x8] sm:$0xff]  ;;  %v24_v2 = vld [vmem:[%s952_s1 + $0x18] sm:$0xff]  ;;  %143 = vmatprep.mubr.f32.mxu0 %v619_v3  ;;  %214 = vmatprep.mubr.f32.mxu1 %v619_v3  ;;  %v21_v6 = vld [vmem:[%s952_s1] sm:$0xff] }
   0x2   :  { %v26_v1 = vld [vmem:[%s952_s1 + $0x28] sm:$0xff]  ;;  %v28_v5 = vld [vmem:[%s952_s1 + $0x38] sm:$0xff]  ;;  %v25_v7 = vld [vmem:[%s952_s1 + $0x20] sm:$0xff] }
   0x3   :  { %v522_v4 = vpack.c.bf16 %v26_v1, %v22_v0  ;;  %v538_v8 = vpack.c.bf16 %v28_v5, %v24_v2  ;;  %v524_v9 = vpack.c.bf16 %v25_v7, %v21_v6  ;;  %v23_v10 = vld [vmem:[%s952_s1 + $0x10] sm:$0xff]  ;;  %v30_v12 = vld [vmem:[%s952_s1 + $0x48] sm:$0xff]  ;;  %v32_v15 = vld [vmem:[%s952_s1 + $0x58] sm:$0xff] }
   0x4   :  { %v27_v11 = vld [vmem:[%s952_s1 + $0x30] sm:$0xff]  ;;  %v34_v14 = vld [vmem:[%s952_s1 + $0x68] sm:$0xff]  ;;  %v36_v16 = vld [vmem:[%s952_s1 + $0x78] sm:$0xff] }
   0x5   :  { %523 = vmatprep.subr.bf16.mxu0 %v522_v4  ;;  %v540_v13 = vpack.c.bf16 %v27_v11, %v23_v10  ;;  %539 = vmatprep.subr.bf16.mxu1 %v538_v8  ;;  %v526_v17 = vpack.c.bf16 %v34_v14, %v30_v12  ;;  %v542_v18 = vpack.c.bf16 %v36_v16, %v32_v15  ;;  %v29_v19 = vld [vmem:[%s952_s1 + $0x40] sm:$0xff]  ;;  %v31_v21 = vld [vmem:[%s952_s1 + $0x50] sm:$0xff]  ;;  %v38_v24 = vld [vmem:[%s952_s1 + $0x88] sm:$0xff] }
   0x6   :  { %525 = vmatpush1.bf16.msra.mxu0 %v524_v9  ;;  %v33_v20 = vld [vmem:[%s952_s1 + $0x60] sm:$0xff]  ;;  %v35_v23 = vld [vmem:[%s952_s1 + $0x70] sm:$0xff]  ;;  %v42_v25 = vld [vmem:[%s952_s1 + $0xa8] sm:$0xff] }
   0x7   :  { %541 = vmatpush1.bf16.msra.mxu1 %v540_v13  ;;  %v528_v22 = vpack.c.bf16 %v33_v20, %v29_v19  ;;  %527 = vmatprep.subr.bf16.mxu0 %v526_v17  ;;  %v544_v26 = vpack.c.bf16 %v35_v23, %v31_v21  ;;  %v530_v27 = vpack.c.bf16 %v42_v25, %v38_v24  ;;  %v40_v28 = vld [vmem:[%s952_s1 + $0x98] sm:$0xff]  ;;  %v37_v30 = vld [vmem:[%s952_s1 + $0x80] sm:$0xff]  ;;  %v39_v33 = vld [vmem:[%s952_s1 + $0x90] sm:$0xff] }
   0x8   :  { %543 = vmatprep.subr.bf16.mxu1 %v542_v18  ;;  %v44_v29 = vld [vmem:[%s952_s1 + $0xb8] sm:$0xff]  ;;  %v41_v32 = vld [vmem:[%s952_s1 + $0xa0] sm:$0xff]  ;;  %v43_v34 = vld [vmem:[%s952_s1 + $0xb0] sm:$0xff] }
   0x9   :  { %v546_v31 = vpack.c.bf16 %v44_v29, %v40_v28  ;;  %v532_v35 = vpack.c.bf16 %v41_v32, %v37_v30  ;;  %v46_v36 = vld [vmem:[%s952_s1 + $0xc8] sm:$0xff]  ;;  %v48_v38 = vld [vmem:[%s952_s1 + $0xd8] sm:$0xff]  ;;  %v548_v39 = vpack.c.bf16 %v43_v34, %v39_v33  ;;  %v45_v42 = vld [vmem:[%s952_s1 + $0xc0] sm:$0xff] }
   0xa   :  { %529 = vmatpush1.bf16.msra.mxu0 %v528_v22  ;;  %v50_v37 = vld [vmem:[%s952_s1 + $0xe8] sm:$0xff]  ;;  %v52_v41 = vld [vmem:[%s952_s1 + $0xf8] sm:$0xff]  ;;  %v49_v43 = vld [vmem:[%s952_s1 + $0xe0] sm:$0xff] }
   0xb   :  { %545 = vmatpush1.bf16.msra.mxu1 %v544_v26  ;;  %531 = vmatprep.subr.bf16.mxu0 %v530_v27  ;;  %v534_v40 = vpack.c.bf16 %v50_v37, %v46_v36  ;;  %v550_v44 = vpack.c.bf16 %v52_v41, %v48_v38  ;;  %v47_v45 = vld [vmem:[%s952_s1 + $0xd0] sm:$0xff]  ;;  %v249_v47 = vld [vmem:[%s953_s3 + $0x80] sm:$0xff]  ;;  %v250_v48 = vld [vmem:[%s953_s3 + $0x88] sm:$0xff]  ;;  %v536_v50 = vpack.c.bf16 %v49_v43, %v45_v42 }
   0xc   :  { %547 = vmatprep.subr.bf16.mxu1 %v546_v31  ;;  %v51_v46 = vld [vmem:[%s952_s1 + $0xf0] sm:$0xff]  ;;  %v281_v49 = vld [vmem:[%s953_s3 + $0x180] sm:$0xff]  ;;  %v282_v51 = vld [vmem:[%s953_s3 + $0x188] sm:$0xff]  ;;  %v554_v53 = vpack.c.bf16 %v250_v48, %v249_v47 }
   0xd   :  { %v552_v52 = vpack.c.bf16 %v51_v46, %v47_v45  ;;  %v233_v54 = vld [vmem:[%s953_s3] sm:$0xff]  ;;  %v234_v55 = vld [vmem:[%s953_s3 + $0x8] sm:$0xff]  ;;  %v586_v57 = vpack.c.bf16 %v282_v51, %v281_v49  ;;  %v251_v59 = vld [vmem:[%s953_s3 + $0x90] sm:$0xff] }
   0xe   :  { %533 = vmatpush1.bf16.msra.mxu0 %v532_v35  ;;  %v265_v56 = vld [vmem:[%s953_s3 + $0x100] sm:$0xff]  ;;  %v266_v58 = vld [vmem:[%s953_s3 + $0x108] sm:$0xff]  ;;  %v252_v60 = vld [vmem:[%s953_s3 + $0x98] sm:$0xff]  ;;  %v556_v0 = vpack.c.bf16 %v234_v55, %v233_v54 }
   0xf   :  { %549 = vmatpush1.bf16.msra.mxu1 %v548_v39  ;;  %535 = vmatprep.subr.bf16.mxu0 %v534_v40  ;;  %v283_v61 = vld [vmem:[%s953_s3 + $0x190] sm:$0xff]  ;;  %v284_v62 = vld [vmem:[%s953_s3 + $0x198] sm:$0xff]  ;;  %v20_v63 = vld [vmem:[%s954_s0] sm:$0xff]  ;;  %v588_v1 = vpack.c.bf16 %v266_v58, %v265_v56  ;;  %v558_v2 = vpack.c.bf16 %v252_v60, %v251_v59 }
  0x10   :  { %551 = vmatprep.subr.bf16.mxu1 %v550_v44  ;;  %v235_v3 = vld [vmem:[%s953_s3 + $0x10] sm:$0xff]  ;;  %v236_v4 = vld [vmem:[%s953_s3 + $0x18] sm:$0xff]  ;;  %v590_v6 = vpack.c.bf16 %v284_v62, %v283_v61  ;;  %v253_v8 = vld [vmem:[%s953_s3 + $0xa0] sm:$0xff] }
  0x11   :  { %v267_v5 = vld [vmem:[%s953_s3 + $0x110] sm:$0xff]  ;;  %v268_v7 = vld [vmem:[%s953_s3 + $0x118] sm:$0xff]  ;;  %v254_v9 = vld [vmem:[%s953_s3 + $0xa8] sm:$0xff]  ;;  %v560_v12 = vpack.c.bf16 %v236_v4, %v235_v3 }
  0x12   :  { %537 = vmatpush1.bf16.msra.mxu0 %v536_v50  ;;  %v285_v10 = vld [vmem:[%s953_s3 + $0x1a0] sm:$0xff]  ;;  %v286_v11 = vld [vmem:[%s953_s3 + $0x1a8] sm:$0xff]  ;;  %v592_v13 = vpack.c.bf16 %v268_v7, %v267_v5  ;;  %v562_v14 = vpack.c.bf16 %v254_v9, %v253_v8  ;;  %v255_v20 = vld [vmem:[%s953_s3 + $0xb0] sm:$0xff] }
  0x13   :  { %553 = vmatpush1.bf16.msra.mxu1 %v552_v52  ;;  %555 = vmatprep.subr.bf16.mxu0 %v554_v53  ;;  %v237_v15 = vld [vmem:[%s953_s3 + $0x20] sm:$0xff]  ;;  %v238_v16 = vld [vmem:[%s953_s3 + $0x28] sm:$0xff]  ;;  %v594_v18 = vpack.c.bf16 %v286_v11, %v285_v10  ;;  %v256_v21 = vld [vmem:[%s953_s3 + $0xb8] sm:$0xff] }
  0x14   :  { %587 = vmatprep.subr.bf16.mxu1 %v586_v57  ;;  %v269_v17 = vld [vmem:[%s953_s3 + $0x120] sm:$0xff]  ;;  %v270_v19 = vld [vmem:[%s953_s3 + $0x128] sm:$0xff]  ;;  %v287_v22 = vld [vmem:[%s953_s3 + $0x1b0] sm:$0xff]  ;;  %v564_v24 = vpack.c.bf16 %v238_v16, %v237_v15  ;;  %v566_v26 = vpack.c.bf16 %v256_v21, %v255_v20 }
  0x15   :  { %449 = vmatmul.mubr.msk.f32.vlgmr.msra.gmra.mrb[0].mxu0 %vm75_vm0, %v20_v63  ;;  %v288_v23 = vld [vmem:[%s953_s3 + $0x1b8] sm:$0xff]  ;;  %v596_v25 = vpack.c.bf16 %v270_v19, %v269_v17  ;;  %v239_v27 = vld [vmem:[%s953_s3 + $0x30] sm:$0xff]  ;;  %v257_v32 = vld [vmem:[%s953_s3 + $0xc0] sm:$0xff] }
  0x16   :  { %450 = vmatmul.mubr.msk.f32.vlgmr.msra.gmra.mrb[0].mxu1 %vm75_vm0, %v20_v63  ;;  %557 = vmatpush3.bf16.msra.mxu0 %v556_v0  ;;  %v240_v28 = vld [vmem:[%s953_s3 + $0x38] sm:$0xff]  ;;  %v271_v29 = vld [vmem:[%s953_s3 + $0x130] sm:$0xff]  ;;  %v598_v30 = vpack.c.bf16 %v288_v23, %v287_v22  ;;  %v258_v33 = vld [vmem:[%s953_s3 + $0xc8] sm:$0xff] }
  0x17   :  { %589 = vmatpush3.bf16.msra.mxu1 %v588_v1  ;;  %559 = vmatprep.subr.bf16.mxu0 %v558_v2  ;;  %v272_v31 = vld [vmem:[%s953_s3 + $0x138] sm:$0xff]  ;;  %v289_v34 = vld [vmem:[%s953_s3 + $0x1c0] sm:$0xff]  ;;  %v290_v35 = vld [vmem:[%s953_s3 + $0x1c8] sm:$0xff]  ;;  %v568_v36 = vpack.c.bf16 %v240_v28, %v239_v27  ;;  %v570_v38 = vpack.c.bf16 %v258_v33, %v257_v32 }
  0x18   :  { %591 = vmatprep.subr.bf16.mxu1 %v590_v6  ;;  %v600_v37 = vpack.c.bf16 %v272_v31, %v271_v29  ;;  %v241_v39 = vld [vmem:[%s953_s3 + $0x40] sm:$0xff]  ;;  %v242_v40 = vld [vmem:[%s953_s3 + $0x48] sm:$0xff]  ;;  %v602_v42 = vpack.c.bf16 %v290_v35, %v289_v34  ;;  %v259_v44 = vld [vmem:[%s953_s3 + $0xd0] sm:$0xff] }
  0x19   :  { %v273_v41 = vld [vmem:[%s953_s3 + $0x140] sm:$0xff]  ;;  %v274_v43 = vld [vmem:[%s953_s3 + $0x148] sm:$0xff]  ;;  %v260_v45 = vld [vmem:[%s953_s3 + $0xd8] sm:$0xff]  ;;  %v572_v48 = vpack.c.bf16 %v242_v40, %v241_v39 }
  0x1a   :  { %561 = vmatpush3.bf16.msra.mxu0 %v560_v12  ;;  %v291_v46 = vld [vmem:[%s953_s3 + $0x1d0] sm:$0xff]  ;;  %v292_v47 = vld [vmem:[%s953_s3 + $0x1d8] sm:$0xff]  ;;  %v604_v49 = vpack.c.bf16 %v274_v43, %v273_v41  ;;  %v574_v50 = vpack.c.bf16 %v260_v45, %v259_v44  ;;  %v261_v58 = vld [vmem:[%s953_s3 + $0xe0] sm:$0xff] }
  0x1b   :  { %593 = vmatpush3.bf16.msra.mxu1 %v592_v13  ;;  %563 = vmatprep.subr.bf16.mxu0 %v562_v14  ;;  %v243_v51 = vld [vmem:[%s953_s3 + $0x50] sm:$0xff]  ;;  %v244_v52 = vld [vmem:[%s953_s3 + $0x58] sm:$0xff]  ;;  %v606_v53 = vpack.c.bf16 %v292_v47, %v291_v46  ;;  %v262_v59 = vld [vmem:[%s953_s3 + $0xe8] sm:$0xff] }
  0x1c   :  { %595 = vmatprep.subr.bf16.mxu1 %v594_v18  ;;  %v275_v54 = vld [vmem:[%s953_s3 + $0x150] sm:$0xff]  ;;  %v276_v55 = vld [vmem:[%s953_s3 + $0x158] sm:$0xff]  ;;  %v576_v56 = vpack.c.bf16 %v244_v52, %v243_v51  ;;  %v293_v60 = vld [vmem:[%s953_s3 + $0x1e0] sm:$0xff]  ;;  %v578_v61 = vpack.c.bf16 %v262_v59, %v261_v58  ;;  %v55_v18 = vlaneseq }
  0x1d   :  { %v608_v57 = vpack.c.bf16 %v276_v55, %v275_v54  ;;  %v294_v62 = vld [vmem:[%s953_s3 + $0x1e8] sm:$0xff]  ;;  %v245_v63 = vld [vmem:[%s953_s3 + $0x60] sm:$0xff]  ;;  %v263_v6 = vld [vmem:[%s953_s3 + $0xf0] sm:$0xff] }
  0x1e   :  { %565 = vmatpush3.bf16.msra.mxu0 %v564_v24  ;;  %v246_v0 = vld [vmem:[%s953_s3 + $0x68] sm:$0xff]  ;;  %v610_v1 = vpack.c.bf16 %v294_v62, %v293_v60  ;;  %v277_v3 = vld [vmem:[%s953_s3 + $0x160] sm:$0xff]  ;;  %v264_v7 = vld [vmem:[%s953_s3 + $0xf8] sm:$0xff]  ;;  %v56_v19 = vshrl.u32 %v55_v18, 7 }
  0x1f   :  { %597 = vmatpush3.bf16.msra.mxu1 %v596_v25  ;;  %567 = vmatprep.subr.bf16.mxu0 %v566_v26  ;;  %v580_v2 = vpack.c.bf16 %v246_v0, %v245_v63  ;;  %v278_v4 = vld [vmem:[%s953_s3 + $0x168] sm:$0xff]  ;;  %v295_v8 = vld [vmem:[%s953_s3 + $0x1f0] sm:$0xff]  ;;  %v582_v9 = vpack.c.bf16 %v264_v7, %v263_v6  ;;  %v296_v10 = vld [vmem:[%s953_s3 + $0x1f8] sm:$0xff] }
  0x20   :  { %599 = vmatprep.subr.bf16.mxu1 %v598_v30  ;;  %v612_v5 = vpack.c.bf16 %v278_v4, %v277_v3  ;;  %v247_v11 = vld [vmem:[%s953_s3 + $0x70] sm:$0xff]  ;;  %v248_v12 = vld [vmem:[%s953_s3 + $0x78] sm:$0xff]  ;;  %v614_v13 = vpack.c.bf16 %v296_v10, %v295_v8  ;;  %v57_v20 = vsub.s32 0, %v56_v19  ;;  %v53_v21 = vld [vmem:[%s955_s2] sm:$0xf]  ;;  %v65_v22 = vsub.s32 2, %v56_v19 }
  0x21   :  { %v584_v14 = vpack.c.bf16 %v248_v12, %v247_v11  ;;  %v279_v15 = vld [vmem:[%s953_s3 + $0x170] sm:$0xff]  ;;  %v280_v16 = vld [vmem:[%s953_s3 + $0x178] sm:$0xff]  ;;  %v61_v23 = vsub.s32 1, %v56_v19  ;;  %v69_v24 = vsub.s32 3, %v56_v19  ;;  %v451_v47 = vld [vmem:[%s956_s4] ss:$0 sm:$0xff] }
  0x22   :  { %569 = vmatpush3.bf16.msra.mxu0 %v568_v36  ;;  %v616_v17 = vpack.c.bf16 %v280_v16, %v279_v15  ;;  %v58_v25 = vrot.slane %v53_v21, %v57_v20  ;;  %v66_v26 = vrot.slane %v53_v21, %v65_v22 }
  0x23   :  { %601 = vmatpush3.bf16.msra.mxu1 %v600_v37  ;;  %571 = vmatprep.subr.bf16.mxu0 %v570_v38  ;;  %v62_v27 = vrot.slane %v53_v21, %v61_v23  ;;  %v70_v28 = vrot.slane %v53_v21, %v69_v24 }
  0x24   :  { %603 = vmatprep.subr.bf16.mxu1 %v602_v42 }
  0x26   :  { %573 = vmatpush3.bf16.msra.mxu0 %v572_v48 }
  0x27   :  { %605 = vmatpush3.bf16.msra.mxu1 %v604_v49  ;;  %575 = vmatprep.subr.bf16.mxu0 %v574_v50 }
  0x28   :  { %607 = vmatprep.subr.bf16.mxu1 %v606_v53 }
  0x2a   :  { %577 = vmatpush3.bf16.msra.mxu0 %v576_v56 }
  0x2b   :  { %609 = vmatpush3.bf16.msra.mxu1 %v608_v57  ;;  %579 = vmatprep.subr.bf16.mxu0 %v578_v61 }
  0x2c   :  { %611 = vmatprep.subr.bf16.mxu1 %v610_v1 }
  0x2e   :  { %581 = vmatpush3.bf16.msra.mxu0 %v580_v2 }
  0x2f   :  { %613 = vmatpush3.bf16.msra.mxu1 %v612_v5  ;;  %583 = vmatprep.subr.bf16.mxu0 %v582_v9 }
  0x30   :  { %615 = vmatprep.subr.bf16.mxu1 %v614_v13 }
  0x32   :  { %585 = vmatpush3.bf16.msra.mxu0 %v584_v14 }
  0x33   :  { %617 = vmatpush3.bf16.msra.mxu1 %v616_v17 }
  0xe8   :  { %v145_v29 = vpop.f32.mrb[0].mxu0 }
  0xe9   :  { %v146_v30 = vadd.f32 %v145_v29, %v58_v25  ;;  %v216_v31 = vpop.f32.mrb[0].mxu1  ;;  %v147_v32 = vpop.f32.mrb[1].mxu0 }
  0xea   :  { %v217_v33 = vadd.f32 %v216_v31, %v66_v26  ;;  %v148_v34 = vadd.f32 %v147_v32, %v62_v27  ;;  %v218_v35 = vpop.f32.mrb[1].mxu1 }
  0xeb   :  { %v225_v36 = vmul.f32 0.01, %v146_v30  ;;  %v219_v37 = vadd.f32 %v218_v35, %v70_v28  ;;  %vm221_vm1 = vcmp.ge.f32.partialorder %v146_v30, 0.0 }
  0xec   :  { %v227_v38 = vmul.f32 0.01, %v217_v33  ;;  %v226_v39 = vmul.f32 0.01, %v148_v34  ;;  %vm222_vm2 = vcmp.ge.f32.partialorder %v148_v34, 0.0  ;;  %vm223_vm3 = vcmp.ge.f32.partialorder %v217_v33, 0.0 }
  0xed   :  { %v228_v40 = vmul.f32 0.01, %v219_v37  ;;  %vm224_vm4 = vcmp.ge.f32.partialorder %v219_v37, 0.0  ;;  %v229_v43 = vsel %vm221_vm1, %v146_v30, %v225_v36 }
  0xee   :  { %v230_v41 = vsel %vm222_vm2, %v148_v34, %v226_v39  ;;  %v231_v44 = vsel %vm223_vm3, %v217_v33, %v227_v38 }
  0xef   :  { %368 = vmatprep.mubr.f32.mxu0 %v230_v41  ;;  %v232_v42 = vsel %vm224_vm4, %v219_v37, %v228_v40 }
  0xf0   :  { %438 = vmatprep.mubr.f32.mxu1 %v232_v42  ;;  %369 = vmatmul.mubr.f32.vlgmr.msra.gmra.mrb[2].mxu0 %v229_v43 }
  0xf1   :  { %439 = vmatmul.mubr.f32.vlgmr.msra.gmra.mrb[2].mxu1 %v231_v44 }
 0x1c3   :  { %v484_v45 = vpop.f32.mrb[2].mxu0 }
 0x1c4   :  { %v519_v46 = vpop.f32.mrb[2].mxu1  ;;  %v485_v48 = vpop.f32.mrb[3].mxu0 }
 0x1c5   :  { %v486_v49 = vadd.f32 %v485_v48, %v484_v45  ;;  %v520_v50 = vpop.f32.mrb[3].mxu1 }
 0x1c6   :  { %v521_v51 = vadd.f32 %v520_v50, %v519_v46 }
 0x1c7   :  { %v371_v52 = vadd.f32 %v486_v49, %v451_v47 }
 0x1c9   :  { %v441_v53 = vadd.f32 %v521_v51, %v371_v52 }
 0x1cb   :  { %444 = vst [vmem:[%s957_s5] sm:$0xff] %v441_v53 }

</bundles_post_ra>
